<compile_context>
chip_gen: v6e
topology: v6e:2x2x1
jax: 0.10.0
libtpu: 0.0.40
codegen_flags: <defaults>
</compile_context>

<pallas_src>
import numpy as np
import jax
import jax.numpy as jnp
from jax import lax
from jax.experimental import pallas as pl
from jax.experimental.pallas import tpu as pltpu


# ----------------------------------------------------------------------------
# Pallas kernel: fused temporal cross attention for one (n-block, t) grid point
#   q_ref, kp_ref, kn_ref : (Bn, H, S, D)   -- q[t], k[t-1] (clamped), k[t+1] (clamped)
#   w1_ref, w2_ref        : (S, S, C)       -- gathered rel-pos tables (resident)
#   o_ref                 : (Bn, L, C)      -- ret[:, t]  (L = S + 1, row 0 = class token)
# ----------------------------------------------------------------------------
def _temporal_xattn_fused_kernel(q_ref, kp_ref, kn_ref, w1_ref, w2_ref, o_ref):
    Bn, H, S, D = q_ref.shape
    C = o_ref.shape[-1]
    t = pl.program_id(1)
    num_t = pl.num_programs(1)
    scale = 1.0 / float(D) ** 0.5

    # fold the 1/sqrt(D) scale into q once (native dtype, no f32 upcast)
    q = (q_ref[...] * scale).reshape(Bn * H, S, D)

    def mean_head_attn(k_val):
        k3 = k_val.reshape(Bn * H, S, D)
        # (Bn*H, Sq, Sk) scores on the MXU, single leading batch dim
        s = lax.dot_general(q, k3, (((2,), (2,)), ((0,), (0,))),
                            preferred_element_type=jnp.float32)
        s = s - jnp.max(s, axis=-1, keepdims=True)
        p = jnp.exp(s)
        p = p * pl.reciprocal(jnp.sum(p, axis=-1, keepdims=True), approx=True)
        # mean over heads (free leading-dim reshape + major-axis reduction)
        return jnp.mean(p.reshape(Bn, H, S, S), axis=1)          # (Bn, Sq, Sk) f32

    attn1 = mean_head_attn(kp_ref[...])     # half1: q[t] . k[t-1]  -> w1
    attn2 = mean_head_attn(kn_ref[...])     # half2: q[t] . k[t+1]  -> w2

    # edge masks: half1 only contributes for t > 0, half2 only for t < T-1
    m1 = jnp.where(t > 0, 1.0, 0.0)
    m2 = jnp.where(t < num_t - 1, 1.0, 0.0)

    # out[b, q, c] = sum_k attn[b, q, k] * w[q, k, c]
    # -> move Sq to the leading (batch) position so both operands have a
    #    leading batch dim and the contraction runs on the MXU.
    attn1_q = pltpu.einshape("bqk->qbk", attn1 * m1)             # (Sq, Bn, Sk)
    attn2_q = pltpu.einshape("bqk->qbk", attn2 * m2)             # (Sq, Bn, Sk)
    dn = (((2,), (1,)), ((0,), (0,)))
    out_q = lax.dot_general(attn1_q, w1_ref[...], dn,
                            preferred_element_type=jnp.float32)
    out_q = out_q + lax.dot_general(attn2_q, w2_ref[...], dn,
                                    preferred_element_type=jnp.float32)  # (Sq, Bn, C)

    # prepend the zero class-token row (cheap major-axis concat) and store the
    # whole (Bn, L, C) block in one go.
    out_full = jnp.concatenate(
        [jnp.zeros((1, Bn, C), jnp.float32), out_q], axis=0)     # (L, Bn, C)
    o_ref[...] = pltpu.einshape("lbc->blc", out_full).astype(o_ref.dtype)


def _pick_block_n(n, cap=16):
    """Largest divisor of n not exceeding `cap` (keeps VMEM per step bounded)."""
    for b in range(min(n, cap), 0, -1):
        if n % b == 0:
            return b
    return 1


def temporal_cross_attention_forward(q, k, w1, w2, idx, *, block_n=None,
                                     vmem_limit_bytes=64 * 1024 * 1024):
    """q, k: [N, T, L, H, D]; w1, w2: [w_size, C]; idx: [S, S] int32.
    Returns [N, T, L, C] float32 (same semantics as the PyTorch module)."""
    N, T, L, H, D = q.shape
    S = L - 1
    C = w1.shape[-1]

    # gather relative-position weights once (glue, plain JAX)
    w1_u = jnp.take(w1, idx, axis=0)                        # (S, S, C)
    w2_u = jnp.take(w2, idx, axis=0)                        # (S, S, C)

    # head-major spatial tokens (class token dropped), done ONCE for both halves
    q_s = jnp.transpose(q[:, :, 1:], (0, 1, 3, 2, 4))       # (N, T, H, S, D)
    k_s = jnp.transpose(k[:, :, 1:], (0, 1, 3, 2, 4))       # (N, T, H, S, D)

    bn = block_n or _pick_block_n(N)
    grid = (N // bn, T)
    qk_block = (bn, None, H, S, D)

    out = pl.pallas_call(
        _temporal_xattn_fused_kernel,
        out_shape=jax.ShapeDtypeStruct((N, T, L, C), jnp.float32),
        grid_spec=pltpu.PrefetchScalarGridSpec(
            num_scalar_prefetch=0,
            grid=grid,
            in_specs=[
                pl.BlockSpec(qk_block, lambda nb, t: (nb, t, 0, 0, 0)),
                pl.BlockSpec(qk_block,
                             lambda nb, t: (nb, jnp.maximum(t - 1, 0), 0, 0, 0)),
                pl.BlockSpec(qk_block,
                             lambda nb, t: (nb, jnp.minimum(t + 1, T - 1), 0, 0, 0)),
                # resident rel-pos tables: constant index_map => DMA'd once
                pl.BlockSpec((S, S, C), lambda nb, t: (0, 0, 0)),
                pl.BlockSpec((S, S, C), lambda nb, t: (0, 0, 0)),
            ],
            out_specs=pl.BlockSpec((bn, None, L, C), lambda nb, t: (nb, t, 0, 0)),
        ),
        compiler_params=pltpu.CompilerParams(
            dimension_semantics=("parallel", "parallel"),
            vmem_limit_bytes=vmem_limit_bytes,
        ),
    )(q_s, k_s, k_s, w1_u, w2_u)
    return out


# ----------------------------------------------------------------------------
# Module-level glue: relative-position index table (same as the PyTorch __init__)
# ----------------------------------------------------------------------------
def build_rel_pos_index(spatial_size):
    h, w = spatial_size
    S = h * w
    idx = np.zeros((S, S), dtype=np.int32)
    for qq in range(S):
        qi, qj = qq // w, qq % w
        for kk in range(S):
            ki, kj = kk // w, kk % w
            i_offs = qi - ki + h - 1
            j_offs = qj - kj + w - 1
            idx[qq, kk] = i_offs * (w * 2 - 1) + j_offs
    return idx


# ----------------------------------------------------------------------------
# Pure-JAX reference (mirrors the PyTorch forward exactly)
# ----------------------------------------------------------------------------
def _ref_forward_half(q, k, w_unroll):
    q = q[:, :, 1:]
    k = k[:, :, 1:]
    D = q.shape[-1]
    attn = jnp.einsum('ntqhd,ntkhd->ntqkh', q / float(D) ** 0.5, k)
    attn = jax.nn.softmax(attn, axis=-2).mean(axis=-1)
    return jnp.einsum('ntqk,qkc->ntqc', attn, w_unroll)


def _ref_forward(q, k, w1, w2, idx):
    N, T, L, H, D = q.shape
    C = w1.shape[-1]
    w1_u = jnp.take(w1, idx, axis=0)
    w2_u = jnp.take(w2, idx, axis=0)
    ret = jnp.zeros((N, T, L, C), dtype=jnp.float32)
    ret = ret.at[:, 1:, 1:, :].add(_ref_forward_half(q[:, 1:], k[:, :-1], w1_u))
    ret = ret.at[:, :-1, 1:, :].add(_ref_forward_half(q[:, :-1], k[:, 1:], w2_u))
    return ret


if __name__ == "__main__":
    # small shapes consistent with the module
    spatial_size = (4, 4)            # S = 16, L = 17
    feature_dim = 32                 # C
    N, T, H, D = 2, 4, 2, 8
    S = spatial_size[0] * spatial_size[1]
    L = S + 1
    w_size = (spatial_size[0] * 2 - 1) * (spatial_size[1] * 2 - 1)

    key = jax.random.PRNGKey(0)
    kq, kk, kw1, kw2 = jax.random.split(key, 4)
    q = jax.random.normal(kq, (N, T, L, H, D), dtype=jnp.float32)
    k = jax.random.normal(kk, (N, T, L, H, D), dtype=jnp.float32)
    # Module init is torch.zeros (trivially zero output); use deterministic
    # small random values instead so the kernel result is non-trivial.
    w1 = 0.02 * jax.random.normal(kw1, (w_size, feature_dim), dtype=jnp.float32)
    w2 = 0.02 * jax.random.normal(kw2, (w_size, feature_dim), dtype=jnp.float32)

    idx = jnp.asarray(build_rel_pos_index(spatial_size))

    fwd = jax.jit(temporal_cross_attention_forward)
    out = jax.block_until_ready(fwd(q, k, w1, w2, idx))

    ref = jax.block_until_ready(_ref_forward(q, k, w1, w2, idx))
    assert out.shape == (N, T, L, feature_dim)
    # approx EUP reciprocal in the softmax gives ~1e-4..1e-3 relative deviation
    np.testing.assert_allclose(np.asarray(out), np.asarray(ref), atol=1e-3, rtol=1e-2)

    print("KERNEL_OK")
</pallas_src>

<mosaic_0001>
module attributes {stable_mosaic.version = 11 : i64} {
  func.func @_temporal_xattn_fused_kernel(%arg0: i32, %arg1: i32, %arg2: memref<2x1x2x16x8xf32, #tpu.memory_space<vmem>>, %arg3: memref<2x1x2x16x8xf32, #tpu.memory_space<vmem>>, %arg4: memref<2x1x2x16x8xf32, #tpu.memory_space<vmem>>, %arg5: memref<16x16x32xf32, #tpu.memory_space<vmem>>, %arg6: memref<16x16x32xf32, #tpu.memory_space<vmem>>, %arg7: memref<2x1x17x32xf32, #tpu.memory_space<vmem>>) attributes {dimension_semantics = [#tpu.dimension_semantics<parallel>, #tpu.dimension_semantics<parallel>], iteration_bounds = array<i64: 1, 4>, scalar_prefetch = 0 : i64, scratch_operands = 0 : i64, tpu.core_type = #tpu.core_type<tc>, window_params = [{transform_indices = @transform_0, window_bounds = array<i64: 2, 1, 2, 16, 8>}, {transform_indices = @transform_1, window_bounds = array<i64: 2, 1, 2, 16, 8>}, {transform_indices = @transform_2, window_bounds = array<i64: 2, 1, 2, 16, 8>}, {pipeline_mode = #tpu.pipeline_mode<synchronous>, transform_indices = @transform_3, window_bounds = array<i64: 16, 16, 32>}, {pipeline_mode = #tpu.pipeline_mode<synchronous>, transform_indices = @transform_4, window_bounds = array<i64: 16, 16, 32>}, {transform_indices = @transform_5, window_bounds = array<i64: 2, 1, 17, 32>}]} {
    %c0 = arith.constant 0 : index
    %c0_0 = arith.constant 0 : index
    %c0_1 = arith.constant 0 : index
    %c0_2 = arith.constant 0 : index
    %c0_3 = arith.constant 0 : index
    %0 = vector.load %arg2[%c0, %c0_0, %c0_1, %c0_2, %c0_3] : memref<2x1x2x16x8xf32, #tpu.memory_space<vmem>>, vector<2x1x2x16x8xf32>
    %1 = vector.shape_cast %0 : vector<2x1x2x16x8xf32> to vector<2x2x16x8xf32>
    %cst = arith.constant 0.353553385 : f32
    %2 = vector.broadcast %cst : f32 to vector<2x2x16x8xf32>
    %3 = arith.mulf %1, %2 : vector<2x2x16x8xf32>
    %4 = vector.shape_cast %3 : vector<2x2x16x8xf32> to vector<4x16x8xf32>
    %c0_4 = arith.constant 0 : index
    %c0_5 = arith.constant 0 : index
    %c0_6 = arith.constant 0 : index
    %c0_7 = arith.constant 0 : index
    %c0_8 = arith.constant 0 : index
    %5 = vector.load %arg3[%c0_4, %c0_5, %c0_6, %c0_7, %c0_8] : memref<2x1x2x16x8xf32, #tpu.memory_space<vmem>>, vector<2x1x2x16x8xf32>
    %6 = vector.shape_cast %5 : vector<2x1x2x16x8xf32> to vector<2x2x16x8xf32>
    %7 = vector.shape_cast %6 : vector<2x2x16x8xf32> to vector<4x16x8xf32>
    %cst_9 = arith.constant dense<0.000000e+00> : vector<4x16x16xf32>
    %8 = tpu.matmul %4, %7, %cst_9 {dimension_numbers = #tpu.dot_dimension_numbers<[2], [2], [1], [1], [0, 0, 0, 1, 1, 1], [0], [0]>} : vector<4x16x8xf32>, vector<4x16x8xf32>, vector<4x16x16xf32> -> vector<4x16x16xf32>
    %cst_10 = arith.constant dense<0xFF800000> : vector<4x16xf32>
    %9 = vector.multi_reduction <maximumf>, %8, %cst_10 [2] : vector<4x16x16xf32> to vector<4x16xf32>
    %10 = vector.shape_cast %9 : vector<4x16xf32> to vector<4x16x1xf32>
    %11 = vector.broadcast %10 : vector<4x16x1xf32> to vector<4x16x16xf32>
    %12 = arith.subf %8, %11 : vector<4x16x16xf32>
    %13 = math.exp %12 : vector<4x16x16xf32>
    %cst_11 = arith.constant dense<0.000000e+00> : vector<4x16xf32>
    %14 = vector.multi_reduction <add>, %13, %cst_11 [2] : vector<4x16x16xf32> to vector<4x16xf32>
    %15 = vector.shape_cast %14 : vector<4x16xf32> to vector<4x16x1xf32>
    %16 = tpu.reciprocal %15 {approx = true} : vector<4x16x1xf32> -> vector<4x16x1xf32>
    %17 = vector.broadcast %16 : vector<4x16x1xf32> to vector<4x16x16xf32>
    %18 = arith.mulf %13, %17 : vector<4x16x16xf32>
    %19 = vector.shape_cast %18 : vector<4x16x16xf32> to vector<2x2x16x16xf32>
    %cst_12 = arith.constant dense<0.000000e+00> : vector<2x16x16xf32>
    %20 = vector.multi_reduction <add>, %19, %cst_12 [1] : vector<2x2x16x16xf32> to vector<2x16x16xf32>
    %cst_13 = arith.constant 2.000000e+00 : f32
    %21 = vector.broadcast %cst_13 : f32 to vector<2x16x16xf32>
    %22 = arith.divf %20, %21 : vector<2x16x16xf32>
    %c0_14 = arith.constant 0 : index
    %c0_15 = arith.constant 0 : index
    %c0_16 = arith.constant 0 : index
    %c0_17 = arith.constant 0 : index
    %c0_18 = arith.constant 0 : index
    %23 = vector.load %arg4[%c0_14, %c0_15, %c0_16, %c0_17, %c0_18] : memref<2x1x2x16x8xf32, #tpu.memory_space<vmem>>, vector<2x1x2x16x8xf32>
    %24 = vector.shape_cast %23 : vector<2x1x2x16x8xf32> to vector<2x2x16x8xf32>
    %25 = vector.shape_cast %24 : vector<2x2x16x8xf32> to vector<4x16x8xf32>
    %cst_19 = arith.constant dense<0.000000e+00> : vector<4x16x16xf32>
    %26 = tpu.matmul %4, %25, %cst_19 {dimension_numbers = #tpu.dot_dimension_numbers<[2], [2], [1], [1], [0, 0, 0, 1, 1, 1], [0], [0]>} : vector<4x16x8xf32>, vector<4x16x8xf32>, vector<4x16x16xf32> -> vector<4x16x16xf32>
    %cst_20 = arith.constant dense<0xFF800000> : vector<4x16xf32>
    %27 = vector.multi_reduction <maximumf>, %26, %cst_20 [2] : vector<4x16x16xf32> to vector<4x16xf32>
    %28 = vector.shape_cast %27 : vector<4x16xf32> to vector<4x16x1xf32>
    %29 = vector.broadcast %28 : vector<4x16x1xf32> to vector<4x16x16xf32>
    %30 = arith.subf %26, %29 : vector<4x16x16xf32>
    %31 = math.exp %30 : vector<4x16x16xf32>
    %cst_21 = arith.constant dense<0.000000e+00> : vector<4x16xf32>
    %32 = vector.multi_reduction <add>, %31, %cst_21 [2] : vector<4x16x16xf32> to vector<4x16xf32>
    %33 = vector.shape_cast %32 : vector<4x16xf32> to vector<4x16x1xf32>
    %34 = tpu.reciprocal %33 {approx = true} : vector<4x16x1xf32> -> vector<4x16x1xf32>
    %35 = vector.broadcast %34 : vector<4x16x1xf32> to vector<4x16x16xf32>
    %36 = arith.mulf %31, %35 : vector<4x16x16xf32>
    %37 = vector.shape_cast %36 : vector<4x16x16xf32> to vector<2x2x16x16xf32>
    %cst_22 = arith.constant dense<0.000000e+00> : vector<2x16x16xf32>
    %38 = vector.multi_reduction <add>, %37, %cst_22 [1] : vector<2x2x16x16xf32> to vector<2x16x16xf32>
    %cst_23 = arith.constant 2.000000e+00 : f32
    %39 = vector.broadcast %cst_23 : f32 to vector<2x16x16xf32>
    %40 = arith.divf %38, %39 : vector<2x16x16xf32>
    %c0_i32 = arith.constant 0 : i32
    %41 = arith.cmpi sgt, %arg1, %c0_i32 : i32
    %cst_24 = arith.constant 1.000000e+00 : f32
    %cst_25 = arith.constant 0.000000e+00 : f32
    %42 = arith.select %41, %cst_24, %cst_25 : f32
    %c3_i32 = arith.constant 3 : i32
    %43 = arith.cmpi slt, %arg1, %c3_i32 : i32
    %cst_26 = arith.constant 1.000000e+00 : f32
    %cst_27 = arith.constant 0.000000e+00 : f32
    %44 = arith.select %43, %cst_26, %cst_27 : f32
    %45 = vector.broadcast %42 : f32 to vector<2x16x16xf32>
    %46 = arith.mulf %22, %45 : vector<2x16x16xf32>
    %47 = tpu.transpose %46, [1, 0, 2] : vector<2x16x16xf32> -> vector<16x2x16xf32>
    %48 = vector.broadcast %44 : f32 to vector<2x16x16xf32>
    %49 = arith.mulf %40, %48 : vector<2x16x16xf32>
    %50 = tpu.transpose %49, [1, 0, 2] : vector<2x16x16xf32> -> vector<16x2x16xf32>
    %c0_28 = arith.constant 0 : index
    %c0_29 = arith.constant 0 : index
    %c0_30 = arith.constant 0 : index
    %51 = vector.load %arg5[%c0_28, %c0_29, %c0_30] : memref<16x16x32xf32, #tpu.memory_space<vmem>>, vector<16x16x32xf32>
    %cst_31 = arith.constant dense<0.000000e+00> : vector<16x2x32xf32>
    %52 = tpu.matmul %47, %51, %cst_31 {dimension_numbers = #tpu.dot_dimension_numbers<[2], [1], [1], [2], [0, 0, 0, 1, 1, 2], [0], [0]>} : vector<16x2x16xf32>, vector<16x16x32xf32>, vector<16x2x32xf32> -> vector<16x2x32xf32>
    %c0_32 = arith.constant 0 : index
    %c0_33 = arith.constant 0 : index
    %c0_34 = arith.constant 0 : index
    %53 = vector.load %arg6[%c0_32, %c0_33, %c0_34] : memref<16x16x32xf32, #tpu.memory_space<vmem>>, vector<16x16x32xf32>
    %cst_35 = arith.constant dense<0.000000e+00> : vector<16x2x32xf32>
    %54 = tpu.matmul %50, %53, %cst_35 {dimension_numbers = #tpu.dot_dimension_numbers<[2], [1], [1], [2], [0, 0, 0, 1, 1, 2], [0], [0]>} : vector<16x2x16xf32>, vector<16x16x32xf32>, vector<16x2x32xf32> -> vector<16x2x32xf32>
    %55 = arith.addf %52, %54 : vector<16x2x32xf32>
    %cst_36 = arith.constant 0.000000e+00 : f32
    %56 = vector.broadcast %cst_36 : f32 to vector<1x2x32xf32>
    %57 = tpu.concatenate %56, %55 in 0 : vector<1x2x32xf32>, vector<16x2x32xf32> -> vector<17x2x32xf32>
    %58 = tpu.transpose %57, [1, 0, 2] : vector<17x2x32xf32> -> vector<2x17x32xf32>
    %c0_37 = arith.constant 0 : index
    %c0_38 = arith.constant 0 : index
    %c0_39 = arith.constant 0 : index
    %c0_40 = arith.constant 0 : index
    %59 = vector.load %arg7[%c0_37, %c0_38, %c0_39, %c0_40] : memref<2x1x17x32xf32, #tpu.memory_space<vmem>>, vector<2x1x17x32xf32>
    %60 = vector.shape_cast %59 : vector<2x1x17x32xf32> to vector<2x17x32xf32>
    %61 = vector.shape_cast %58 : vector<2x17x32xf32> to vector<2x1x17x32xf32>
    tpu.vector_store %arg7[%c0_37, %c0_38, %c0_39, %c0_40], %61 {strides = array<i32>} : memref<2x1x17x32xf32, #tpu.memory_space<vmem>>, vector<2x1x17x32xf32>,
    return
  }
  func.func @transform_0(%arg0: i32, %arg1: i32) -> (i32, i32, i32, i32, i32) {
    %c0_i32 = arith.constant 0 : i32
    %c0_i32_0 = arith.constant 0 : i32
    %c0_i32_1 = arith.constant 0 : i32
    %c0_i32_2 = arith.constant 0 : i32
    return %arg0, %arg1, %c0_i32, %c0_i32_0, %c0_i32_1 : i32, i32, i32, i32, i32
  }
  func.func @transform_1(%arg0: i32, %arg1: i32) -> (i32, i32, i32, i32, i32) {
    %c1_i32 = arith.constant 1 : i32
    %0 = arith.subi %arg1, %c1_i32 : i32
    %c0_i32 = arith.constant 0 : i32
    %1 = arith.maxsi %0, %c0_i32 : i32
    %c0_i32_0 = arith.constant 0 : i32
    %c0_i32_1 = arith.constant 0 : i32
    %c0_i32_2 = arith.constant 0 : i32
    %c0_i32_3 = arith.constant 0 : i32
    return %arg0, %1, %c0_i32_0, %c0_i32_1, %c0_i32_2 : i32, i32, i32, i32, i32
  }
  func.func @transform_2(%arg0: i32, %arg1: i32) -> (i32, i32, i32, i32, i32) {
    %c1_i32 = arith.constant 1 : i32
    %0 = arith.addi %arg1, %c1_i32 : i32
    %c3_i32 = arith.constant 3 : i32
    %1 = arith.minsi %0, %c3_i32 : i32
    %c0_i32 = arith.constant 0 : i32
    %c0_i32_0 = arith.constant 0 : i32
    %c0_i32_1 = arith.constant 0 : i32
    %c0_i32_2 = arith.constant 0 : i32
    return %arg0, %1, %c0_i32, %c0_i32_0, %c0_i32_1 : i32, i32, i32, i32, i32
  }
  func.func @transform_3(%arg0: i32, %arg1: i32) -> (i32, i32, i32) {
    %c0_i32 = arith.constant 0 : i32
    %c0_i32_0 = arith.constant 0 : i32
    %c0_i32_1 = arith.constant 0 : i32
    %c0_i32_2 = arith.constant 0 : i32
    return %c0_i32, %c0_i32_0, %c0_i32_1 : i32, i32, i32
  }
  func.func @transform_4(%arg0: i32, %arg1: i32) -> (i32, i32, i32) {
    %c0_i32 = arith.constant 0 : i32
    %c0_i32_0 = arith.constant 0 : i32
    %c0_i32_1 = arith.constant 0 : i32
    %c0_i32_2 = arith.constant 0 : i32
    return %c0_i32, %c0_i32_0, %c0_i32_1 : i32, i32, i32
  }
  func.func @transform_5(%arg0: i32, %arg1: i32) -> (i32, i32, i32, i32) {
    %c0_i32 = arith.constant 0 : i32
    %c0_i32_0 = arith.constant 0 : i32
    %c0_i32_1 = arith.constant 0 : i32
    return %arg0, %arg1, %c0_i32, %c0_i32_0 : i32, i32, i32, i32
  }
}

</mosaic_0001>

<bundles_post_ra>
// kernel: temporal_cross_attention_forward.1
= control target key start
LH: loop header
LB: loop body
LE: loop exit
PB: predicated region body
PF: predicated region fallthrough
CT: control target
= control target key end

     0   :  { %s6023_s0 = inlined_call_operand.vmem [shape: f32[2,4,2,16,8], index: 0, kind: input, shape index: {}]   ;;  %s6024_s1 = inlined_call_operand.vmem [shape: f32[2,4,2,16,8], index: 1, kind: input, shape index: {}, may-alias: {1,2}]   ;;  %s6025_s2 = inlined_call_operand.vmem [shape: f32[2,4,2,16,8], index: 2, kind: input, shape index: {}, may-alias: {1,2}]   ;;  %s6026_s3 = inlined_call_operand.vmem [shape: f32[16,16,32], index: 3, kind: input, shape index: {}]   ;;  %s6027_s4 = inlined_call_operand.vmem [shape: f32[16,16,32], index: 4, kind: input, shape index: {}]   ;;  %s6028_s5 = inlined_call_operand.vmem [shape: f32[2,4,17,32], index: 5, kind: output, shape index: {}]  }
   0x1   :  { %6030 = sst [smem:[#allocation7_spill]] %s6023_s0 }
   0x2   :  { %s5142_s18 = smov 0   ;;  %s5144_s19 = smov 0  }
   0x3   :  { %s5146_s20 = smov 0   ;;  %s5148_s21 = smov 0  }
   0x4   :  { %s5150_s22 = smov 0   ;;  %s5152_s23 = smov 0  }
   0x5   :  { %s5154_s24 = smov 0   ;;  %s5156_s25 = smov 0  }
   0x6   :  { %s5158_s26 = smov 0  }
   0x7 LB: > { %s24_s27 = sadd.s32 1, %s5102_s25  ;;  %s36_s28 = sadd.s32 1, %s5094_s23  ;;  %s5106_s26 = sphi %s5158_s26, %s15_s26   ;;  %s5102_s25 = sphi %s5156_s25, %s6045_s25   ;;  %s5098_s24 = sphi %s5154_s24, %s6044_s24   ;;  %s5094_s23 = sphi %s5152_s23, %s6043_s23   ;;  %s5090_s22 = sphi %s5150_s22, %s6042_s22   ;;  %s5086_s21 = sphi %s5148_s21, %s6041_s21   ;;  %s5082_s20 = sphi %s5146_s20, %s6040_s20   ;;  %s5078_s19 = sphi %s5144_s19, %s6039_s19   ;;  %s5074_s18 = sphi %s5142_s18, %s6038_s18  }
   0x8   : > { %p25_p0 = scmp.ge.s32.totalorder %s24_s27, 4  ;;  %p43_p1 = scmp.ne.s32.totalorder %s5094_s23, %s5090_s22 }
   0x9   : > { %p44_p2 = scmp.eq.s32.totalorder %s5106_s26, 0  ;;  %s4398_s6 = sadd.s32 4294967295, %s5102_s25 }
   0xa   : > { %s5192_s29 = scalar_select %p25_p0, 0, %s24_s27  }
   0xb   : > { %p5199_p3 = por %p44_p2, %p43_p1  ;;  %p60_p4 = scmp.gt.s32.totalorder %s4398_s6, 0 }
   0xc   : > { %6031 = sst [smem:[#allocation6_spill]] %s5192_s29  ;;  %s32_s7 = ssub.s32 %s5102_s25, %s5192_s29 }
   0xd   : > { %p34_p5 = scmp.eq.s32.totalorder %s32_s7, 0  ;;  %s4399_s8 = sadd.s32 4294967295, %s5192_s29 }
   0xe   : > { %s6047_s6 = smov (!%p60_p4, %s4398_s6), 0  ;;  %p63_p6 = scmp.gt.s32.totalorder %s4399_s8, 0 }
   0xf   : > { %s5210_s9 = scalar_select %p34_p5, %s5094_s23, %s36_s28  }
  0x10   : > { %s70_s10 = sadd.s32 1, %s5086_s21  ;;  %p77_p7 = scmp.ne.s32.totalorder %s5086_s21, %s5082_s20 }
  0x11   : > { %p94_p8 = scmp.lt.s32.totalorder %s24_s27, 3  ;;  %s6049_s8 = smov (!%p63_p6, %s4399_s8), 0 }
  0x12   : > { %p5217_p9 = por %p77_p7, %p44_p2  ;;  %s96_s12 = sadd.s32 1, %s5192_s29 }
  0x13   : > { %s66_s13 = ssub.s32 %s6047_s6, %s6049_s8  ;;  %p97_p10 = scmp.lt.s32.totalorder %s96_s12, 3 }
  0x14   : > { %s4396_s14 = sadd.s32 4294967295, %s5106_s26   ;;  %p68_p11 = scmp.eq.s32.totalorder %s66_s13, 0 }
  0x15   : > { %s6051_s27 = smov (!%p94_p8, %s24_s27), 3  ;;  %s6053_s12 = smov (!%p97_p10, %s96_s12), 3 }
  0x16   : > { %s5227_s15 = scalar_select %p68_p11, %s5086_s21, %s70_s10  }
  0x17   : > { %p111_p12 = scmp.ne.s32.totalorder %s5078_s19, %s5074_s18  ;;  %p185_p13 = scmp.eq.s32.totalorder %s4396_s14, 3 }
  0x18   : > { %s100_s16 = ssub.s32 %s6051_s27, %s6053_s12  ;;  %s104_s17 = sadd.s32 1, %s5078_s19 }
  0x19   : > { %p102_p0 = scmp.eq.s32.totalorder %s100_s16, 0  ;;  %p5235_p4 = por %p111_p12, %p44_p2 }
  0x1a   : > { %p5242_p5 = por %p185_p13, %p43_p1  ;;  %p4401_p6 = scmp.ge.s32.totalorder %s5106_s26, 4 }
  0x1b   : > { %s5247_s8 = scalar_select %p102_p0, %s5078_s19, %s104_s17  }
  0x1c   : > { %213 = sbr.rel (%p4401_p6) target bundleno = 63 (0x3f), region = 24 }
  0x21   : > { %216 = sbr.rel (!%p5199_p3) target bundleno = 47 (0x2f), region = 28  ;;  %s218_s10 = sand.u32 (%p5199_p3), 1, %s5094_s23  }
  0x22   : > { %s4483_s12 = sshll.u32 (%p5199_p3), %s5102_s25, 5  ;;  %s4402_s13 = sshll.u32 (%p5199_p3), %s218_s10, 6 }
  0x23   : > { %s6036_s0 = sld [smem:[#allocation7_spill]] (%p5199_p3)  ;;  %s220_s17 = scalar_lea.vmem (%p5199_p3), [#allocation2], %s4402_s13 }
  0x29   : > { %s226_s29 = scalar_lea.vmem %s6036_s0, %s4483_s12 }
  0x2a   : > { %v269_v0 = vld [vmem:[%s226_s29] sm:$0xff]  ;;  %v271_v1 = vld [vmem:[%s226_s29 + $0x8] sm:$0xff]  ;;  %v273_v2 = vld [vmem:[%s226_s29 + $0x10] sm:$0xff] }
  0x2b   : > { %270 = vst [vmem:[%s220_s17] sm:$0xff] %v269_v0  ;;  %272 = vst [vmem:[%s220_s17 + $0x8] sm:$0xff] %v271_v1  ;;  %v275_v3 = vld [vmem:[%s226_s29 + $0x18] sm:$0xff]  ;;  %v277_v4 = vld [vmem:[%s226_s29 + $0x80] sm:$0xff] }
  0x2c   : > { %274 = vst [vmem:[%s220_s17 + $0x10] sm:$0xff] %v273_v2  ;;  %v279_v5 = vld [vmem:[%s226_s29 + $0x88] sm:$0xff]  ;;  %276 = vst [vmem:[%s220_s17 + $0x18] sm:$0xff] %v275_v3  ;;  %v281_v6 = vld [vmem:[%s226_s29 + $0x90] sm:$0xff] }
  0x2d   : > { %278 = vst [vmem:[%s220_s17 + $0x20] sm:$0xff] %v277_v4  ;;  %280 = vst [vmem:[%s220_s17 + $0x28] sm:$0xff] %v279_v5  ;;  %v283_v7 = vld [vmem:[%s226_s29 + $0x98] sm:$0xff] }
  0x2e   : > { %282 = vst [vmem:[%s220_s17 + $0x30] sm:$0xff] %v281_v6  ;;  %284 = vst [vmem:[%s220_s17 + $0x38] sm:$0xff] %v283_v7 }
  0x2f PF: > { %290 = sbr.rel (!%p5217_p9) target bundleno = 55 (0x37), region = 66  ;;  %s292_s30 = sand.u32 (%p5217_p9), 1, %s5086_s21  }
  0x30   : > { %s4484_s10 = sshll.u32 (%p5217_p9), %s6047_s6, 5  ;;  %s4405_s12 = sshll.u32 (%p5217_p9), %s292_s30, 6 }
  0x31   : > { %s303_s16 = scalar_lea.vmem (%p5217_p9), %s6024_s1, %s4484_s10  ;;  %s294_s0 = scalar_lea.vmem (%p5217_p9), [#allocation3], %s4405_s12 }
  0x32   : > { %v346_v8 = vld [vmem:[%s303_s16] sm:$0xff] (%p5217_p9)  ;;  %v348_v9 = vld [vmem:[%s303_s16 + $0x8] sm:$0xff] (%p5217_p9)  ;;  %v350_v10 = vld [vmem:[%s303_s16 + $0x10] sm:$0xff] (%p5217_p9) }
  0x33   : > { %347 = vst [vmem:[%s294_s0] sm:$0xff] (%p5217_p9), %v346_v8  ;;  %349 = vst [vmem:[%s294_s0 + $0x8] sm:$0xff] (%p5217_p9), %v348_v9  ;;  %v352_v11 = vld [vmem:[%s303_s16 + $0x18] sm:$0xff] (%p5217_p9)  ;;  %v354_v12 = vld [vmem:[%s303_s16 + $0x80] sm:$0xff] (%p5217_p9) }
  0x34   : > { %351 = vst [vmem:[%s294_s0 + $0x10] sm:$0xff] %v350_v10  ;;  %v356_v13 = vld [vmem:[%s303_s16 + $0x88] sm:$0xff]  ;;  %353 = vst [vmem:[%s294_s0 + $0x18] sm:$0xff] %v352_v11  ;;  %v358_v14 = vld [vmem:[%s303_s16 + $0x90] sm:$0xff] }
  0x35   : > { %355 = vst [vmem:[%s294_s0 + $0x20] sm:$0xff] %v354_v12  ;;  %357 = vst [vmem:[%s294_s0 + $0x28] sm:$0xff] %v356_v13  ;;  %v360_v15 = vld [vmem:[%s303_s16 + $0x98] sm:$0xff] }
  0x36   : > { %359 = vst [vmem:[%s294_s0 + $0x30] sm:$0xff] %v358_v14  ;;  %361 = vst [vmem:[%s294_s0 + $0x38] sm:$0xff] %v360_v15 }
  0x37 PF: > { %367 = sbr.rel (!%p5235_p4) target bundleno = 63 (0x3f), region = 104  ;;  %s369_s29 = sand.u32 (%p5235_p4), 1, %s5078_s19  }
  0x38   : > { %s4485_s6 = sshll.u32 (%p5235_p4), %s6051_s27, 5  ;;  %s4409_s11 = sshll.u32 (%p5235_p4), %s369_s29, 6 }
  0x39   : > { %s380_s10 = scalar_lea.vmem (%p5235_p4), %s6025_s2, %s4485_s6  ;;  %s371_s12 = scalar_lea.vmem (%p5235_p4), [#allocation4], %s4409_s11 }
  0x3a   : > { %v423_v16 = vld [vmem:[%s380_s10] sm:$0xff] (%p5235_p4)  ;;  %v425_v17 = vld [vmem:[%s380_s10 + $0x8] sm:$0xff] (%p5235_p4)  ;;  %v427_v18 = vld [vmem:[%s380_s10 + $0x10] sm:$0xff] (%p5235_p4) }
  0x3b   : > { %424 = vst [vmem:[%s371_s12] sm:$0xff] (%p5235_p4), %v423_v16  ;;  %426 = vst [vmem:[%s371_s12 + $0x8] sm:$0xff] (%p5235_p4), %v425_v17  ;;  %v429_v19 = vld [vmem:[%s380_s10 + $0x18] sm:$0xff] (%p5235_p4)  ;;  %v431_v20 = vld [vmem:[%s380_s10 + $0x80] sm:$0xff] (%p5235_p4) }
  0x3c   : > { %428 = vst [vmem:[%s371_s12 + $0x10] sm:$0xff] %v427_v18  ;;  %v433_v21 = vld [vmem:[%s380_s10 + $0x88] sm:$0xff]  ;;  %430 = vst [vmem:[%s371_s12 + $0x18] sm:$0xff] %v429_v19  ;;  %v435_v22 = vld [vmem:[%s380_s10 + $0x90] sm:$0xff] }
  0x3d   : > { %432 = vst [vmem:[%s371_s12 + $0x20] sm:$0xff] %v431_v20  ;;  %434 = vst [vmem:[%s371_s12 + $0x28] sm:$0xff] %v433_v21  ;;  %v437_v23 = vld [vmem:[%s380_s10 + $0x98] sm:$0xff] }
  0x3e   : > { %436 = vst [vmem:[%s371_s12 + $0x30] sm:$0xff] %v435_v22  ;;  %438 = vst [vmem:[%s371_s12 + $0x38] sm:$0xff] %v437_v23 }
  0x3f PF: > { %p4412_p1 = scmp.ge.s32.totalorder %s5106_s26, 1  ;;  %p443_p2 = scmp.lt.s32.totalorder %s5106_s26, 5 }
  0x41   : > { %p444_p3 = pnand %p4412_p1, %p443_p2 }
  0x42   : > { %s457_s0 = sand.u32 (!%p444_p3), 1, %s5082_s20   ;;  %s450_s27 = sand.u32 (!%p444_p3), 1, %s5090_s22  }
  0x43   : > { %447 = sbr.rel (%p444_p3) target bundleno = 931 (0x3a3), region = 142  ;;  %s4414_s28 = sshll.u32 (!%p444_p3), %s457_s0, 6 }
  0x44   : > { %s4413_s13 = sshll.u32 (!%p444_p3), %s450_s27, 6  ;;  %s5277_s14 = scalar_lea.vmem (!%p444_p3), [#allocation3], %s4414_s28 }
  0x45   : > { %s5285_s20 = scalar_lea.vmem (!%p444_p3), [#allocation2], %s4413_s13  ;;  %s464_s16 = sand.u32 (!%p444_p3), 1, %s5074_s18  }
  0x46   : > { %s4415_s29 = sshll.u32 (!%p444_p3), %s464_s16, 6  ;;  %p1425_p7 = scmp.lt.s32.totalorder (!%p444_p3), %s5098_s24, 3 }
  0x47   : > { %s466_s18 = scalar_lea.vmem (!%p444_p3), [#allocation4], %s4415_s29  ;;  %p1423_p8 = scmp.gt.s32.totalorder (!%p444_p3), %s5098_s24, 0 }
  0x48   : > { %vm532_vm0 = vcmask 64512   ;;  %v525_v24 = vld [vmem:[%s5277_s14 + $0x8] sm:$0xff]  ;;  %v527_v25 = vld [vmem:[%s5277_s14 + $0x18] sm:$0xff]  ;;  %v524_v26 = vld [vmem:[%s5277_s14] sm:$0xff]  ;;  %vm881_vm1 = vcmask 130048   ;;  %vm5109_vm2 = vmmov 0  }
  0x49   : > { %4614 = vmatprep.subr.msk.mxu0 %vm532_vm0, %v525_v24  ;;  %4621 = vmatprep.subr.msk.mxu1 %vm532_vm0, %v527_v25  ;;  %v526_v27 = vld [vmem:[%s5277_s14 + $0x10] sm:$0xff]  ;;  %v508_v28 = vld [vmem:[%s5285_s20] sm:$0xff]  ;;  %v509_v30 = vld [vmem:[%s5285_s20 + $0x8] sm:$0xff]  ;;  %s1426_s13 = scalar_select %p1425_p7, 1.0, 0.0  ;;  %vm4209_vm3 = vcmask 261120  }
  0x4a   : > { %4615 = vmatpush3.xpose.msk.msra.mxu0 %vm532_vm0, %v525_v24  ;;  %4622 = vmatpush3.xpose.msk.msra.mxu1 %vm532_vm0, %v527_v25  ;;  %v516_v29 = vmul.f32 0.35355338, %v508_v28  ;;  %v510_v31 = vld [vmem:[%s5285_s20 + $0x10] sm:$0xff]  ;;  %v511_v33 = vld [vmem:[%s5285_s20 + $0x18] sm:$0xff]  ;;  %v529_v34 = vld [vmem:[%s5277_s14 + $0x28] sm:$0xff]  ;;  %s4894_s10 = smul.u32 48, %s450_s27 }
  0x4b   : > { %4616 = vmatprep.subr.msk.mxu0 %vm532_vm0, %v524_v26  ;;  %4623 = vmatprep.subr.msk.mxu1 %vm532_vm0, %v526_v27  ;;  %v518_v32 = vmul.f32 0.35355338, %v510_v31  ;;  %v531_v35 = vld [vmem:[%s5277_s14 + $0x38] sm:$0xff]  ;;  %v517_v36 = vmul.f32 0.35355338, %v509_v30  ;;  %v512_v38 = vld [vmem:[%s5285_s20 + $0x20] sm:$0xff] }
  0x4c   : > { %4618 = vmatprep.mubr.msk.f32.mxu0 %vm532_vm0, %v516_v29  ;;  %v519_v37 = vmul.f32 0.35355338, %v511_v33  ;;  %v514_v39 = vld [vmem:[%s5285_s20 + $0x30] sm:$0xff]  ;;  %v528_v40 = vld [vmem:[%s5277_s14 + $0x20] sm:$0xff]  ;;  %v520_v42 = vmul.f32 0.35355338, %v512_v38 }
  0x4d   : > { %4625 = vmatprep.mubr.msk.f32.mxu1 %vm532_vm0, %v518_v32  ;;  %v530_v41 = vld [vmem:[%s5277_s14 + $0x30] sm:$0xff]  ;;  %v522_v43 = vmul.f32 0.35355338, %v514_v39  ;;  %v513_v44 = vld [vmem:[%s5285_s20 + $0x28] sm:$0xff]  ;;  %v515_v45 = vld [vmem:[%s5285_s20 + $0x38] sm:$0xff]  ;;  %s5957_s12 = scalar_lea.vmem [#allocation5], %s4894_s10 }
  0x4e   : > { %4617 = vmatpush3.xpose.msk.msra.mxu0 %vm532_vm0, %v524_v26  ;;  %4624 = vmatpush3.xpose.msk.msra.mxu1 %vm532_vm0, %v526_v27  ;;  %v988_v46 = vld [vmem:[%s466_s18 + $0x8] sm:$0xff]  ;;  %v990_v47 = vld [vmem:[%s466_s18 + $0x18] sm:$0xff]  ;;  %v521_v48 = vmul.f32 0.35355338, %v513_v44  ;;  %v523_v49 = vmul.f32 0.35355338, %v515_v45 }
  0x4f   : > { %4628 = vmatprep.subr.msk.mxu0 %vm532_vm0, %v529_v34  ;;  %4635 = vmatprep.subr.msk.mxu1 %vm532_vm0, %v531_v35  ;;  %v987_v50 = vld [vmem:[%s466_s18] sm:$0xff]  ;;  %v989_v51 = vld [vmem:[%s466_s18 + $0x10] sm:$0xff]  ;;  %v992_v52 = vld [vmem:[%s466_s18 + $0x28] sm:$0xff]  ;;  %s1424_s28 = scalar_select %p1423_p8, 1.0, 0.0  ;;  %vm4212_vm4 = vcmask 253952  }
  0x50   : > { %v994_v53 = vld [vmem:[%s466_s18 + $0x38] sm:$0xff]  ;;  %v991_v54 = vld [vmem:[%s466_s18 + $0x20] sm:$0xff]  ;;  %v993_v55 = vld [vmem:[%s466_s18 + $0x30] sm:$0xff]  ;;  %s4895_s22 = smul.u32 (%p5242_p5), 24, %s5098_s24 }
  0x51   : > { %4619 = vmatmul.mubr.msk.f32.vlgmr.msra.gmra.mxu0 %vm532_vm0, %v517_v36  ;;  %4626 = vmatmul.mubr.msk.f32.vlgmr.msra.gmra.mxu1 %vm532_vm0, %v519_v37 }
  0x52   : > { %4629 = vmatpush3.xpose.msk.msra.mxu0 %vm532_vm0, %v529_v34  ;;  %4636 = vmatpush3.xpose.msk.msra.mxu1 %vm532_vm0, %v531_v35 }
  0x53   : > { %4630 = vmatprep.subr.msk.mxu0 %vm532_vm0, %v528_v40  ;;  %4637 = vmatprep.subr.msk.mxu1 %vm532_vm0, %v530_v41 }
  0x54   : > { %4632 = vmatprep.mubr.msk.f32.mxu0 %vm532_vm0, %v520_v42  ;;  %4639 = vmatprep.mubr.msk.f32.mxu1 %vm532_vm0, %v522_v43 }
  0x56   : > { %4631 = vmatpush3.xpose.msk.msra.mxu0 %vm532_vm0, %v528_v40  ;;  %4638 = vmatpush3.xpose.msk.msra.mxu1 %vm532_vm0, %v530_v41 }
  0x57   : > { %4642 = vmatprep.subr.msk.mxu0 %vm532_vm0, %v988_v46  ;;  %4649 = vmatprep.subr.msk.mxu1 %vm532_vm0, %v990_v47 }
  0x59   : > { %4633 = vmatmul.mubr.msk.f32.vlgmr.msra.gmra.mxu0 %vm532_vm0, %v521_v48  ;;  %4640 = vmatmul.mubr.msk.f32.vlgmr.msra.gmra.mxu1 %vm532_vm0, %v523_v49 }
  0x5a   : > { %4643 = vmatpush3.xpose.msk.msra.mxu0 %vm532_vm0, %v988_v46  ;;  %4650 = vmatpush3.xpose.msk.msra.mxu1 %vm532_vm0, %v990_v47 }
  0x5b   : > { %4644 = vmatprep.subr.msk.mxu0 %vm532_vm0, %v987_v50  ;;  %4651 = vmatprep.subr.msk.mxu1 %vm532_vm0, %v989_v51 }
  0x5c   : > { %4646 = vmatprep.mubr.msk.f32.mxu0 %vm532_vm0, %v516_v29  ;;  %4653 = vmatprep.mubr.msk.f32.mxu1 %vm532_vm0, %v518_v32 }
  0x5e   : > { %4645 = vmatpush3.xpose.msk.msra.mxu0 %vm532_vm0, %v987_v50  ;;  %4652 = vmatpush3.xpose.msk.msra.mxu1 %vm532_vm0, %v989_v51 }
  0x5f   : > { %4656 = vmatprep.subr.msk.mxu0 %vm532_vm0, %v992_v52  ;;  %4663 = vmatprep.subr.msk.mxu1 %vm532_vm0, %v994_v53 }
  0x61   : > { %4647 = vmatmul.mubr.msk.f32.vlgmr.msra.gmra.mxu0 %vm532_vm0, %v517_v36  ;;  %4654 = vmatmul.mubr.msk.f32.vlgmr.msra.gmra.mxu1 %vm532_vm0, %v519_v37 }
  0x62   : > { %4657 = vmatpush3.xpose.msk.msra.mxu0 %vm532_vm0, %v992_v52  ;;  %4664 = vmatpush3.xpose.msk.msra.mxu1 %vm532_vm0, %v994_v53 }
  0x63   : > { %4658 = vmatprep.subr.msk.mxu0 %vm532_vm0, %v991_v54  ;;  %4665 = vmatprep.subr.msk.mxu1 %vm532_vm0, %v993_v55 }
  0x64   : > { %4660 = vmatprep.mubr.msk.f32.mxu0 %vm532_vm0, %v520_v42  ;;  %4667 = vmatprep.mubr.msk.f32.mxu1 %vm532_vm0, %v522_v43 }
  0x66   : > { %4659 = vmatpush3.xpose.msk.msra.mxu0 %vm532_vm0, %v991_v54  ;;  %4666 = vmatpush3.xpose.msk.msra.mxu1 %vm532_vm0, %v993_v55 }
  0x69   : > { %4661 = vmatmul.mubr.msk.f32.vlgmr.msra.gmra.mxu0 %vm532_vm0, %v521_v48  ;;  %4668 = vmatmul.mubr.msk.f32.vlgmr.msra.gmra.mxu1 %vm532_vm0, %v523_v49 }
 0x111   : > { %v5346_v56 = vpop.f32.mrf.mxu0  ;;  %v5348_v57 = vpop.f32.mrf.mxu1 }
 0x112   : > { %v885_v19 = vsel %vm881_vm1, %v5346_v56, -inf  ;;  %v891_v22 = vsel %vm881_vm1, %v5348_v57, -inf }
 0x113   : > { %v5350_v58 = vpop.f32.mrf.mxu0  ;;  %v5352_v59 = vpop.f32.mrf.mxu1 }
 0x114   : > { %v882_v14 = vsel %vm881_vm1, %v5350_v58, -inf  ;;  %v888_v18 = vsel %vm881_vm1, %v5352_v59, -inf }
 0x119   : > { %v5354_v60 = vpop.f32.mrf.mxu0  ;;  %v5356_v61 = vpop.f32.mrf.mxu1 }
 0x11a   : > { %v897_v21 = vsel %vm881_vm1, %v5354_v60, -inf  ;;  %v903_v23 = vsel %vm881_vm1, %v5356_v61, -inf }
 0x11b   : > { %v5358_v62 = vpop.f32.mrf.mxu0  ;;  %v5360_v63 = vpop.f32.mrf.mxu1 }
 0x11c   : > { %v894_v17 = vsel %vm881_vm1, %v5358_v62, -inf  ;;  %v900_v20 = vsel %vm881_vm1, %v5360_v63, -inf }
 0x121   : > { %v4648_v0 = vpop.f32.mrf.mxu0  ;;  %v5362_v1 = vpop.f32.mrf.mxu1 }
 0x122   : > { %v1322_v9 = vsel %vm881_vm1, %v4648_v0, -inf  ;;  %v1328_v15 = vsel %vm881_vm1, %v5362_v1, -inf }
 0x123   : > { %v1067_v2 = vpop.f32.mrf.mxu0  ;;  %v1148_v3 = vpop.f32.mrf.mxu1 }
 0x124   : > { %v1319_v4 = vsel %vm881_vm1, %v1067_v2, -inf  ;;  %v1325_v5 = vsel %vm881_vm1, %v1148_v3, -inf }
 0x125   : > { %1320 = vmax.xlane.f32.xlu0 %v1319_v4 }
 0x129   : > { %1326 = vmax.xlane.f32.xlu0 %v1325_v5  ;;  %v4662_v6 = vpop.f32.mrf.mxu0  ;;  %v5366_v7 = vpop.f32.mrf.mxu1 }
 0x12a   : > { %v1334_v12 = vsel %vm881_vm1, %v4662_v6, -inf  ;;  %v1340_v16 = vsel %vm881_vm1, %v5366_v7, -inf }
 0x12b   : > { %v1229_v8 = vpop.f32.mrf.mxu0  ;;  %v1310_v11 = vpop.f32.mrf.mxu1 }
 0x12c   : > { %v1331_v10 = vsel %vm881_vm1, %v1229_v8, -inf  ;;  %v1337_v13 = vsel %vm881_vm1, %v1310_v11, -inf }
 0x12d   : > { %1323 = vmax.xlane.f32.xlu0 %v1322_v9  ;;  %1332 = vmax.xlane.f32.xlu1 %v1331_v10 }
 0x131   : > { %1335 = vmax.xlane.f32.xlu0 %v1334_v12  ;;  %1338 = vmax.xlane.f32.xlu1 %v1337_v13 }
 0x135   : > { %883 = vmax.xlane.f32.xlu0 %v882_v14  ;;  %1329 = vmax.xlane.f32.xlu1 %v1328_v15 }
 0x139   : > { %1341 = vmax.xlane.f32.xlu1 %v1340_v16  ;;  %895 = vmax.xlane.f32.xlu0 %v894_v17 }
 0x13d   : > { %889 = vmax.xlane.f32.xlu1 %v888_v18  ;;  %886 = vmax.xlane.f32.xlu0 %v885_v19 }
 0x141   : > { %901 = vmax.xlane.f32.xlu1 %v900_v20  ;;  %898 = vmax.xlane.f32.xlu0 %v897_v21 }
 0x145   : > { %892 = vmax.xlane.f32.xlu1 %v891_v22 }
 0x149   : > { %904 = vmax.xlane.f32.xlu1 %v903_v23 }
 0x1ae   : > { %v1321_v24 = vpop.xlane.xlu0 %1320 }
 0x1af   : > { %v1343_v25 = vsub.f32 %v1067_v2, %v1321_v24 }
 0x1b1   : > { %v1351_v26 = vmul.f32 1.442695, %v1343_v25 }
 0x1b2   : > { %v1327_v27 = vpop.xlane.xlu0 %1326 }
 0x1b3   : > { %4972 = vpow2.f32 %v1351_v26  ;;  %v1345_v28 = vsub.f32 %v1148_v3, %v1327_v27 }
 0x1b5   : > { %v1355_v29 = vmul.f32 1.442695, %v1345_v28 }
 0x1b6   : > { %v1324_v30 = vpop.xlane.xlu0 %1323  ;;  %v1333_v31 = vpop.xlane.xlu1 %1332 }
 0x1b7   : > { %4974 = vpow2.f32 %v1355_v29  ;;  %v1344_v32 = vsub.f32 %v4648_v0, %v1324_v30  ;;  %v1347_v33 = vsub.f32 %v1229_v8, %v1333_v31 }
 0x1b9   : > { %v1359_v34 = vmul.f32 1.442695, %v1347_v33  ;;  %v1353_v35 = vmul.f32 1.442695, %v1344_v32 }
 0x1ba   : > { %v1336_v36 = vpop.xlane.xlu0 %1335  ;;  %v1339_v37 = vpop.xlane.xlu1 %1338 }
 0x1bb   : > { %v1348_v38 = vsub.f32 %v4662_v6, %v1336_v36  ;;  %v1349_v39 = vsub.f32 %v1310_v11, %v1339_v37  ;;  %4976 = vpow2.f32 %v1359_v34 }
 0x1bc   : > { %4978 = vpow2.f32 %v1353_v35 }
 0x1bd   : > { %v1363_v40 = vmul.f32 1.442695, %v1349_v39  ;;  %v1361_v41 = vmul.f32 1.442695, %v1348_v38 }
 0x1be   : > { %v884_v42 = vpop.xlane.xlu0 %883  ;;  %v1330_v43 = vpop.xlane.xlu1 %1329 }
 0x1bf   : > { %v906_v44 = vsub.f32 %v5350_v58, %v884_v42  ;;  %v1346_v45 = vsub.f32 %v5362_v1, %v1330_v43  ;;  %4980 = vpow2.f32 %v1363_v40  ;;  %v5108_v40 = vmov 0.0   ;;  %v1733_v42 = vld [vmem:[%s6027_s4] sm:$0xff]  ;;  %v1736_v43 = vld [vmem:[%s6027_s4 + $0x18] sm:$0xff] }
 0x1c0   : > { %v5394_v46 = vpop.eup %4972  ;;  %4982 = vpow2.f32 %v1361_v41  ;;  %4670 = vmatprep.subr.mxu0 %v5108_v40  ;;  %4677 = vmatprep.subr.mxu1 %v5108_v40  ;;  %v1734_v41 = vld [vmem:[%s6027_s4 + $0x8] sm:$0xff] }
 0x1c1   : > { %v1357_v47 = vmul.f32 1.442695, %v1346_v45  ;;  %v1367_v48 = vsel %vm881_vm1, %v5394_v46, 0.0  ;;  %v914_v49 = vmul.f32 1.442695, %v906_v44  ;;  %4671 = vmatpush3.msra.mxu0 %v1734_v41  ;;  %4674 = vmatprep.mubr.msk.f32.mxu0 %vm5109_vm2, %v5108_v40  ;;  %v1735_v44 = vld [vmem:[%s6027_s4 + $0x10] sm:$0xff] }
 0x1c2   : > { %v1342_v50 = vpop.xlane.xlu1 %1341  ;;  %1368 = vadd.xlane.f32.xlu0 %v1367_v48  ;;  %v896_v51 = vpop.xlane.xlu0 %895  ;;  %4672 = vmatprep.subr.mxu0 %v5108_v40 }
 0x1c3   : > { %v1350_v52 = vsub.f32 %v5366_v7, %v1342_v50  ;;  %v910_v53 = vsub.f32 %v5358_v62, %v896_v51  ;;  %4984 = vpow2.f32 %v1357_v47  ;;  %4673 = vmatpush3.msra.mxu0 %v1733_v42  ;;  %4678 = vmatpush3.msra.mxu1 %v1736_v43 }
 0x1c4   : > { %v5400_v54 = vpop.eup %4974  ;;  %4986 = vpow2.f32 %v914_v49  ;;  %4684 = vmatprep.subr.mxu0 %v5108_v40  ;;  %4679 = vmatprep.subr.mxu1 %v5108_v40 }
 0x1c5   : > { %v1365_v55 = vmul.f32 1.442695, %v1350_v52  ;;  %v1373_v58 = vsel %vm881_vm1, %v5400_v54, 0.0  ;;  %v922_v0 = vmul.f32 1.442695, %v910_v53  ;;  %4681 = vmatprep.mubr.msk.f32.mxu1 %vm5109_vm2, %v5108_v40  ;;  %4680 = vmatpush3.msra.mxu1 %v1735_v44 }
 0x1c6   : > { %1374 = vadd.xlane.f32.xlu1 %v1373_v58  ;;  %v890_v1 = vpop.xlane.xlu1 %889  ;;  %v887_v2 = vpop.xlane.xlu0 %886  ;;  %4691 = vmatprep.subr.mxu1 %v5108_v40 }
 0x1c7   : > { %4988 = vpow2.f32 %v1365_v55  ;;  %v908_v3 = vsub.f32 %v5352_v59, %v890_v1  ;;  %v907_v4 = vsub.f32 %v5346_v56, %v887_v2 }
 0x1c8   : > { %v5406_v5 = vpop.eup %4976  ;;  %4990 = vpow2.f32 %v922_v0 }
 0x1c9   : > { %v918_v62 = vmul.f32 1.442695, %v908_v3  ;;  %v916_v6 = vmul.f32 1.442695, %v907_v4  ;;  %v1379_v8 = vsel %vm881_vm1, %v5406_v5, 0.0  ;;  %v5410_v10 = vpop.eup %4978 }
 0x1ca   : > { %v902_v7 = vpop.xlane.xlu1 %901  ;;  %v899_v9 = vpop.xlane.xlu0 %898  ;;  %1380 = vadd.xlane.f32.xlu0 %v1379_v8  ;;  %v1370_v16 = vsel %vm881_vm1, %v5410_v10, 0.0  ;;  %v1436_v8 = vlaneseq }
 0x1cb   : > { %4992 = vpow2.f32 %v918_v62  ;;  %v912_v11 = vsub.f32 %v5360_v63, %v902_v7  ;;  %v911_v59 = vsub.f32 %v5354_v60, %v899_v9 }
 0x1cc   : > { %v5414_v12 = vpop.eup %4980  ;;  %4994 = vpow2.f32 %v916_v6  ;;  %v5110_v6 = vmov 1983009808  }
 0x1cd   : > { %v926_v56 = vmul.f32 1.442695, %v912_v11  ;;  %v924_v13 = vmul.f32 1.442695, %v911_v59  ;;  %v1385_v14 = vsel %vm881_vm1, %v5414_v12, 0.0  ;;  %v5420_v17 = vpop.eup %4982  ;;  %v1434_v7 = vunpack.c.l.s4 %v5110_v6  ;;  %v1739_v6 = vld [vmem:[%s6027_s4 + $0x30] sm:$0xff] }
 0x1ce   : > { %v893_v15 = vpop.xlane.xlu1 %892  ;;  %1386 = vadd.xlane.f32.xlu1 %v1385_v14  ;;  %1371 = vadd.xlane.f32.xlu0 %v1370_v16  ;;  %v1382_v21 = vsel %vm881_vm1, %v5420_v17, 0.0  ;;  %v5111_v11 = vmov 1934713408   ;;  %v1437_v14 = vshrl.u32 %v1436_v8, 7 }
 0x1cf   : > { %4996 = vpow2.f32 %v926_v56  ;;  %v909_v63 = vsub.f32 %v5348_v57, %v893_v15  ;;  %v1465_v59 = vunpack.c.l.s4 %v5111_v11 }
 0x1d0   : > { %v5423_v60 = vpop.eup %4984  ;;  %4998 = vpow2.f32 %v924_v13  ;;  %v1435_v13 = vunpack.c.0.s8 %v1434_v7 }
 0x1d1   : > { %v920_v18 = vmul.f32 1.442695, %v909_v63  ;;  %v1376_v19 = vsel %vm881_vm1, %v5423_v60, 0.0  ;;  %v5429_v22 = vpop.eup %4986  ;;  %v5497_v63 = vstv %s1426_s13 }
 0x1d2   : > { %v905_v20 = vpop.xlane.xlu1 %904  ;;  %1377 = vadd.xlane.f32.xlu1 %v1376_v19  ;;  %1383 = vadd.xlane.f32.xlu0 %v1382_v21  ;;  %v930_v26 = vsel %vm881_vm1, %v5429_v22, 0.0  ;;  %v1466_v19 = vunpack.c.0.s8 %v1465_v59 }
 0x1d3   : > { %5000 = vpow2.f32 %v920_v18  ;;  %v913_v23 = vsub.f32 %v5356_v61, %v905_v20 }
 0x1d4   : > { %v5432_v57 = vpop.eup %4988 }
 0x1d5   : > { %v928_v24 = vmul.f32 1.442695, %v913_v23  ;;  %v1388_v25 = vsel %vm881_vm1, %v5432_v57, 0.0  ;;  %v5438_v27 = vpop.eup %4990 }
 0x1d6   : > { %1389 = vadd.xlane.f32.xlu1 %v1388_v25  ;;  %931 = vadd.xlane.f32.xlu0 %v930_v26  ;;  %v942_v29 = vsel %vm881_vm1, %v5438_v27, 0.0 }
 0x1d7   : > { %5002 = vpow2.f32 %v928_v24 }
 0x1d8   : > { %v5440_v28 = vpop.eup %4992 }
 0x1d9   : > { %v936_v61 = vsel %vm881_vm1, %v5440_v28, 0.0  ;;  %v5446_v30 = vpop.eup %4994 }
 0x1da   : > { %937 = vadd.xlane.f32.xlu1 %v936_v61  ;;  %943 = vadd.xlane.f32.xlu0 %v942_v29  ;;  %v933_v33 = vsel %vm881_vm1, %v5446_v30, 0.0 }
 0x1dc   : > { %v5448_v31 = vpop.eup %4996 }
 0x1dd   : > { %v948_v32 = vsel %vm881_vm1, %v5448_v31, 0.0  ;;  %v5454_v34 = vpop.eup %4998 }
 0x1de   : > { %949 = vadd.xlane.f32.xlu1 %v948_v32  ;;  %934 = vadd.xlane.f32.xlu0 %v933_v33  ;;  %v945_v37 = vsel %vm881_vm1, %v5454_v34, 0.0  ;;  %v5504_v33 = vsub.s32 %v1466_v19, %v1437_v14 }
 0x1e0   : > { %v5456_v35 = vpop.eup %5000 }
 0x1e1   : > { %v939_v36 = vsel %vm881_vm1, %v5456_v35, 0.0 }
 0x1e2   : > { %940 = vadd.xlane.f32.xlu1 %v939_v36  ;;  %946 = vadd.xlane.f32.xlu0 %v945_v37 }
 0x1e4   : > { %v5462_v38 = vpop.eup %5002 }
 0x1e5   : > { %v951_v39 = vsel %vm881_vm1, %v5462_v38, 0.0 }
 0x1e6   : > { %952 = vadd.xlane.f32.xlu1 %v951_v39 }
 0x24b   : > { %v1369_v45 = vpop.xlane.xlu0 %1368 }
 0x24c   : > { %5004 = vrcp.f32 %v1369_v45 }
 0x24f   : > { %v1375_v47 = vpop.xlane.xlu1 %1374 }
 0x250   : > { %5006 = vrcp.f32 %v1375_v47 }
 0x253   : > { %v1381_v48 = vpop.xlane.xlu0 %1380 }
 0x254   : > { %5008 = vrcp.f32 %v1381_v48 }
 0x257   : > { %v1387_v49 = vpop.xlane.xlu1 %1386  ;;  %v1372_v50 = vpop.xlane.xlu0 %1371 }
 0x258   : > { %5010 = vrcp.f32 %v1387_v49 }
 0x259   : > { %v5005_v51 = vpop.eup %5004 }
 0x25a   : > { %v1399_v0 = vmul.f32 %v5005_v51, %v5394_v46 }
 0x25b   : > { %v1378_v52 = vpop.xlane.xlu1 %1377  ;;  %v1384_v55 = vpop.xlane.xlu0 %1383 }
 0x25c   : > { %5012 = vrcp.f32 %v1378_v52  ;;  %v1407_v4 = vsel %vm881_vm1, %v1399_v0, 0.0  ;;  %v1740_v0 = vld [vmem:[%s6027_s4 + $0x38] sm:$0xff] }
 0x25d   : > { %v5007_v53 = vpop.eup %5006  ;;  %5014 = vrcp.f32 %v1384_v55 }
 0x25e   : > { %v1401_v58 = vmul.f32 %v5007_v53, %v5400_v54 }
 0x25f   : > { %v1390_v1 = vpop.xlane.xlu1 %1389  ;;  %v932_v32 = vpop.xlane.xlu0 %931 }
 0x260   : > { %v1408_v2 = vsel %vm881_vm1, %v1401_v58, 0.0  ;;  %5016 = vrcp.f32 %v1390_v1  ;;  %v1737_v58 = vld [vmem:[%s6027_s4 + $0x20] sm:$0xff] }
 0x261   : > { %v5009_v3 = vpop.eup %5008  ;;  %5018 = vrcp.f32 %v1372_v50  ;;  %v1409_v62 = vadd.f32 %v1408_v2, %v1407_v4  ;;  %v1738_v50 = vld [vmem:[%s6027_s4 + $0x28] sm:$0xff] }
 0x262   : > { %v1403_v9 = vmul.f32 %v5009_v3, %v5406_v5  ;;  %v5499_v5 = vsub.s32 %v1435_v13, %v1437_v14  ;;  %v1742_v4 = vld [vmem:[%s6027_s4 + $0x48] sm:$0xff]  ;;  %v1743_v13 = vld [vmem:[%s6027_s4 + $0x50] sm:$0xff] }
 0x263   : > { %v1419_v56 = vmul.f32 0.5, %v1409_v62  ;;  %v938_v24 = vpop.xlane.xlu1 %937  ;;  %v944_v52 = vpop.xlane.xlu0 %943 }
 0x264   : > { %v1413_v15 = vsel %vm881_vm1, %v1403_v9, 0.0 }
 0x265   : > { %v5011_v54 = vpop.eup %5010  ;;  %v1565_v23 = vmul.f32 %v5497_v63, %v1419_v56  ;;  %v1746_v56 = vld [vmem:[%s6027_s4 + $0x68] sm:$0xff] }
 0x266   : > { %v1405_v46 = vmul.f32 %v5011_v54, %v5414_v12  ;;  %v1741_v54 = vld [vmem:[%s6027_s4 + $0x40] sm:$0xff] }
 0x267   : > { %v1576_v39 = vrot.slane %v1565_v23, %v5499_v5  ;;  %v950_v47 = vpop.xlane.xlu1 %949  ;;  %v1569_v48 = vcombine.high %v1565_v23, %v5108_v40 }
 0x268   : > { %v1414_v16 = vsel %vm881_vm1, %v1405_v46, 0.0  ;;  %5020 = vrcp.f32 %v950_v47  ;;  %v1744_v46 = vld [vmem:[%s6027_s4 + $0x58] sm:$0xff]  ;;  %v1754_v47 = vld [vmem:[%s6027_s4 + $0xa8] sm:$0xff] }
 0x269   : > { %v1415_v18 = vadd.f32 %v1414_v16, %v1413_v15  ;;  %v5013_v20 = vpop.eup %5012  ;;  %5022 = vrcp.f32 %v938_v24  ;;  %v1583_v3 = vrot.slane %v1569_v48, %v5499_v5  ;;  %v1750_v24 = vld [vmem:[%s6027_s4 + $0x88] sm:$0xff]  ;;  %v1751_v48 = vld [vmem:[%s6027_s4 + $0x90] sm:$0xff] }
 0x26a   : > { %v5015_v12 = vpop.eup %5014  ;;  %v1402_v36 = vmul.f32 %v5013_v20, %v5423_v60  ;;  %5024 = vrcp.f32 %v944_v52 }
 0x26b   : > { %v1421_v21 = vmul.f32 0.5, %v1415_v18  ;;  %v1404_v37 = vmul.f32 %v5015_v12, %v5420_v17  ;;  %5026 = vrcp.f32 %v932_v32  ;;  %v1745_v18 = vld [vmem:[%s6027_s4 + $0x60] sm:$0xff] }
 0x26c   : > { %v1411_v49 = vsel %vm881_vm1, %v1402_v36, 0.0 }
 0x26d   : > { %v5017_v25 = vpop.eup %5016  ;;  %v1567_v26 = vmul.f32 %v5497_v63, %v1421_v21  ;;  %v1416_v60 = vsel %vm881_vm1, %v1404_v37, 0.0  ;;  %v935_v37 = vpop.xlane.xlu0 %934 }
 0x26e   : > { %v5019_v61 = vpop.eup %5018  ;;  %v1406_v29 = vmul.f32 %v5017_v25, %v5432_v57 }
 0x26f   : > { %v1591_v41 = vrot.slane %v1567_v26, %v5499_v5  ;;  %v1584_v42 = vcombine.high %v1567_v26, %v5108_v40  ;;  %v1400_v43 = vmul.f32 %v5019_v61, %v5410_v10  ;;  %v941_v26 = vpop.xlane.xlu1 %940  ;;  %v1747_v61 = vld [vmem:[%s6027_s4 + $0x70] sm:$0xff] }
 0x270   : > { %v1417_v44 = vsel %vm881_vm1, %v1406_v29, 0.0 }
 0x271   : > { %v1599_v45 = vcombine.low %v1576_v39, %v1591_v41  ;;  %v1600_v57 = vcombine.high %v1576_v39, %v1591_v41  ;;  %v1418_v51 = vadd.f32 %v1417_v44, %v1416_v60  ;;  %v1598_v10 = vrot.slane %v1584_v42, %v5499_v5  ;;  %v1749_v41 = vld [vmem:[%s6027_s4 + $0x80] sm:$0xff] }
 0x272   : > { %v1410_v53 = vsel %vm881_vm1, %v1400_v43, 0.0 }
 0x273   : > { %v1607_v17 = vrot.slane %v1599_v45, %v5504_v33  ;;  %v1412_v1 = vadd.f32 %v1411_v49, %v1410_v53  ;;  %v1614_v2 = vrot.slane %v1600_v57, %v5504_v33  ;;  %v1422_v62 = vmul.f32 0.5, %v1418_v51  ;;  %v953_v57 = vpop.xlane.xlu1 %952  ;;  %v947_v51 = vpop.xlane.xlu0 %946 }
 0x274   : > { %v1615_v7 = vcombine.low %v1583_v3, %v1598_v10  ;;  %v1616_v14 = vcombine.high %v1583_v3, %v1598_v10  ;;  %v1753_v10 = vld [vmem:[%s6027_s4 + $0xa0] sm:$0xff]  ;;  %5028 = vrcp.f32 %v953_v57  ;;  %v1758_v3 = vld [vmem:[%s6027_s4 + $0xc8] sm:$0xff] }
 0x275   : > { %4675 = vmatmul.mubr.msk.f32.vlgmr.msra.gmra.mxu0 %vm881_vm1, %v1607_v17  ;;  %v1631_v55 = vcombine.high %v1607_v17, %v5108_v40  ;;  %v1420_v8 = vmul.f32 0.5, %v1412_v1  ;;  %v1632_v9 = vcombine.high %v1614_v2, %v5108_v40  ;;  %v1568_v59 = vmul.f32 %v5497_v63, %v1422_v62  ;;  %v5021_v20 = vpop.eup %5020  ;;  %v1755_v62 = vld [vmem:[%s6027_s4 + $0xb0] sm:$0xff] }
 0x276   : > { %4685 = vmatpush3.msra.mxu0 %v1738_v50  ;;  %4688 = vmatprep.mubr.msk.f32.mxu0 %vm5109_vm2, %v5108_v40  ;;  %v1623_v11 = vrot.slane %v1615_v7, %v5504_v33  ;;  %v1630_v21 = vrot.slane %v1616_v14, %v5504_v33  ;;  %v5023_v12 = vpop.eup %5022  ;;  %v968_v32 = vmul.f32 %v5021_v20, %v5448_v31  ;;  %v1752_v31 = vld [vmem:[%s6027_s4 + $0x98] sm:$0xff]  ;;  %5030 = vrcp.f32 %v941_v26  ;;  %v1763_v26 = vld [vmem:[%s6027_s4 + $0xf0] sm:$0xff] }
 0x277   : > { %4686 = vmatprep.subr.mxu0 %v5108_v40  ;;  %4682 = vmatmul.mubr.msk.f32.vlgmr.msra.gmra.mxu1 %vm881_vm1, %v1631_v55  ;;  %v1566_v15 = vmul.f32 %v5497_v63, %v1420_v8  ;;  %v5576_v19 = vrot.slane %v1568_v59, %v5499_v5  ;;  %v1748_v63 = vld [vmem:[%s6027_s4 + $0x78] sm:$0xff]  ;;  %v5025_v25 = vpop.eup %5024  ;;  %v964_v42 = vmul.f32 %v5023_v12, %v5440_v28  ;;  %5032 = vrcp.f32 %v947_v51 }
 0x278   : > { %4687 = vmatpush3.msra.mxu0 %v1737_v58  ;;  %4692 = vmatpush3.msra.mxu1 %v1740_v0  ;;  %v1633_v16 = vcombine.high %v1623_v11, %v5108_v40  ;;  %v5027_v36 = vpop.eup %5026  ;;  %v1634_v39 = vcombine.high %v1630_v21, %v5108_v40  ;;  %v966_v43 = vmul.f32 %v5025_v25, %v5438_v27  ;;  %v977_v27 = vsel %vm881_vm1, %v968_v32, 0.0  ;;  %v1756_v58 = vld [vmem:[%s6027_s4 + $0xb8] sm:$0xff] }
 0x279   : > { %4698 = vmatprep.subr.mxu0 %v5108_v40  ;;  %4689 = vmatmul.mubr.msk.f32.vlgmr.msra.gmra.mxu0 %vm881_vm1, %v1614_v2  ;;  %v1642_v23 = vrot.slane %v1566_v15, %v5499_v5  ;;  %v1650_v45 = vcombine.high %v1568_v59, %v5108_v40  ;;  %v962_v28 = vmul.f32 %v5027_v36, %v5429_v22  ;;  %v971_v60 = vsel %vm881_vm1, %v964_v42, 0.0 }
 0x27a   : > { %4693 = vmatprep.subr.mxu1 %v5108_v40  ;;  %4699 = vmatpush3.msra.mxu0 %v1742_v4  ;;  %v1635_v49 = vcombine.high %v1566_v15, %v5108_v40  ;;  %v976_v17 = vsel %vm881_vm1, %v966_v43, 0.0  ;;  %5034 = vrcp.f32 %v935_v37  ;;  %v1701_v37 = vld [vmem:[%s6026_s3] sm:$0xff] }
 0x27b   : > { %4694 = vmatpush3.msra.mxu1 %v1739_v6  ;;  %4695 = vmatprep.mubr.msk.f32.mxu1 %vm5109_vm2, %v5108_v40  ;;  %v1665_v29 = vcombine.low %v1642_v23, %v5576_v19  ;;  %v1666_v22 = vcombine.high %v1642_v23, %v5576_v19  ;;  %v978_v50 = vadd.f32 %v977_v27, %v976_v17  ;;  %v970_v55 = vsel %vm881_vm1, %v962_v28, 0.0 }
 0x27c   : > { %4700 = vmatprep.subr.mxu0 %v5108_v40  ;;  %4696 = vmatmul.mubr.msk.f32.vlgmr.msra.gmra.mxu1 %vm881_vm1, %v1632_v9  ;;  %v1664_v53 = vrot.slane %v1650_v45, %v5499_v5  ;;  %v972_v0 = vadd.f32 %v971_v60, %v970_v55  ;;  %v1649_v2 = vrot.slane %v1635_v49, %v5499_v5  ;;  %v1757_v9 = vld [vmem:[%s6027_s4 + $0xc0] sm:$0xff]  ;;  %v1708_v60 = vld [vmem:[%s6026_s3 + $0x38] sm:$0xff] }
 0x27d   : > { %4701 = vmatpush3.msra.mxu0 %v1741_v54  ;;  %4705 = vmatprep.subr.mxu1 %v5108_v40  ;;  %v1673_v44 = vrot.slane %v1665_v29, %v5504_v33  ;;  %v1680_v1 = vrot.slane %v1666_v22, %v5504_v33  ;;  %v985_v4 = vmul.f32 0.5, %v978_v50  ;;  %v1760_v54 = vld [vmem:[%s6027_s4 + $0xd8] sm:$0xff] }
 0x27e   : > { %4702 = vmatprep.mubr.msk.f32.mxu0 %vm5109_vm2, %v5108_v40  ;;  %4706 = vmatpush3.msra.mxu1 %v1744_v46  ;;  %v1681_v6 = vcombine.low %v1649_v2, %v1664_v53  ;;  %v983_v7 = vmul.f32 0.5, %v972_v0  ;;  %v5673_v46 = vstv %s1424_s28  ;;  %v1682_v14 = vcombine.high %v1649_v2, %v1664_v53  ;;  %v1707_v53 = vld [vmem:[%s6026_s3 + $0x30] sm:$0xff]  ;;  %v1712_v2 = vld [vmem:[%s6026_s3 + $0x58] sm:$0xff]  ;;  %s4229_s28 = scalar_lea.vmem (%p5242_p5), %s6028_s5, %s4895_s22 }
 0x27f   : > { %4712 = vmatprep.subr.mxu0 %v5108_v40  ;;  %4703 = vmatmul.mubr.msk.f32.vlgmr.msra.gmra.mxu0 %vm881_vm1, %v1623_v11  ;;  %v1697_v52 = vcombine.high %v1673_v44, %v5108_v40  ;;  %v1698_v8 = vcombine.high %v1680_v1, %v5108_v40  ;;  %v1430_v59 = vmul.f32 %v5673_v46, %v985_v4 }
 0x280   : > { %4707 = vmatprep.subr.mxu1 %v5108_v40  ;;  %4713 = vmatpush3.msra.mxu0 %v1746_v56  ;;  %v1689_v11 = vrot.slane %v1681_v6, %v5504_v33  ;;  %v1762_v56 = vld [vmem:[%s6027_s4 + $0xe8] sm:$0xff]  ;;  %v1428_v15 = vmul.f32 %v5673_v46, %v983_v7  ;;  %v1711_v6 = vld [vmem:[%s6026_s3 + $0x50] sm:$0xff] }
 0x281   : > { %4708 = vmatpush3.msra.mxu1 %v1743_v13  ;;  %4709 = vmatprep.mubr.msk.f32.mxu1 %vm5109_vm2, %v5108_v40  ;;  %v1759_v13 = vld [vmem:[%s6027_s4 + $0xd0] sm:$0xff]  ;;  %v5697_v19 = vrot.slane %v1430_v59, %v5499_v5  ;;  %v5029_v20 = vpop.eup %5028  ;;  %v1447_v43 = vcombine.high %v1430_v59, %v5108_v40 }
 0x282   : > { %4714 = vmatprep.subr.mxu0 %v5108_v40  ;;  %4710 = vmatmul.mubr.msk.f32.vlgmr.msra.gmra.mxu1 %vm881_vm1, %v1633_v16  ;;  %v1699_v16 = vcombine.high %v1689_v11, %v5108_v40  ;;  %v1439_v23 = vrot.slane %v1428_v15, %v5499_v5  ;;  %v969_v29 = vmul.f32 %v5029_v20, %v5462_v38  ;;  %v1704_v38 = vld [vmem:[%s6026_s3 + $0x18] sm:$0xff] }
 0x283   : > { %4715 = vmatpush3.msra.mxu0 %v1745_v18  ;;  %4719 = vmatprep.subr.mxu1 %v5108_v40  ;;  %v1761_v18 = vld [vmem:[%s6027_s4 + $0xe0] sm:$0xff]  ;;  %v5031_v12 = vpop.eup %5030  ;;  %v1461_v22 = vrot.slane %v1447_v43, %v5499_v5  ;;  %v1728_v43 = vld [vmem:[%s6026_s3 + $0xd8] sm:$0xff] }
 0x284   : > { %4716 = vmatprep.mubr.msk.f32.mxu0 %vm5109_vm2, %v5108_v40  ;;  %4720 = vmatpush3.msra.mxu1 %v1748_v63  ;;  %v1764_v63 = vld [vmem:[%s6027_s4 + $0xf8] sm:$0xff]  ;;  %v5033_v25 = vpop.eup %5032  ;;  %v1463_v45 = vcombine.high %v1439_v23, %v5697_v19 }
 0x285   : > { %4726 = vmatprep.subr.mxu0 %v5108_v40  ;;  %4717 = vmatmul.mubr.msk.f32.vlgmr.msra.gmra.mxu0 %vm881_vm1, %v1630_v21  ;;  %v1696_v21 = vrot.slane %v1682_v14, %v5504_v33  ;;  %v1715_v14 = vld [vmem:[%s6026_s3 + $0x70] sm:$0xff] }
 0x286   : > { %4721 = vmatprep.subr.mxu1 %v5108_v40  ;;  %4727 = vmatpush3.msra.mxu0 %v1750_v24  ;;  %v1702_v24 = vld [vmem:[%s6026_s3 + $0x8] sm:$0xff]  ;;  %v1477_v50 = vrot.slane %v1463_v45, %v5504_v33 }
 0x287   : > { %4722 = vmatpush3.msra.mxu1 %v1747_v61  ;;  %4723 = vmatprep.mubr.msk.f32.mxu1 %vm5109_vm2, %v5108_v40  ;;  %v1462_v61 = vcombine.low %v1439_v23, %v5697_v19  ;;  %v5035_v32 = vpop.eup %5034  ;;  %v1700_v36 = vcombine.high %v1696_v21, %v5108_v40  ;;  %v1720_v19 = vld [vmem:[%s6026_s3 + $0x98] sm:$0xff]  ;;  %v1719_v23 = vld [vmem:[%s6026_s3 + $0x90] sm:$0xff] }
 0x288   : > { %4728 = vmatprep.subr.mxu0 %v5108_v40  ;;  %4724 = vmatmul.mubr.msk.f32.vlgmr.msra.gmra.mxu1 %vm881_vm1, %v1634_v39  ;;  %v965_v39 = vmul.f32 %v5031_v12, %v5456_v35  ;;  %v963_v35 = vmul.f32 %v5035_v32, %v5446_v30  ;;  %v1432_v30 = vcombine.high %v1428_v15, %v5108_v40 }
 0x289   : > { %4729 = vmatpush3.msra.mxu0 %v1749_v41  ;;  %4733 = vmatprep.subr.mxu1 %v5108_v40  ;;  %v967_v41 = vmul.f32 %v5033_v25, %v5454_v34  ;;  %v1470_v42 = vrot.slane %v1462_v61, %v5504_v33  ;;  %v980_v34 = vsel %vm881_vm1, %v969_v29, 0.0  ;;  %v1495_v0 = vcombine.high %v1477_v50, %v5108_v40  ;;  %v1724_v29 = vld [vmem:[%s6026_s3 + $0xb8] sm:$0xff] }
 0x28a   : > { %4730 = vmatprep.mubr.msk.f32.mxu0 %vm5109_vm2, %v5108_v40  ;;  %4734 = vmatpush3.msra.mxu1 %v1752_v31  ;;  %v1706_v31 = vld [vmem:[%s6026_s3 + $0x28] sm:$0xff]  ;;  %v974_v28 = vsel %vm881_vm1, %v965_v39, 0.0  ;;  %v973_v49 = vsel %vm881_vm1, %v963_v35, 0.0  ;;  %v1446_v51 = vrot.slane %v1432_v30, %v5499_v5  ;;  %v1723_v39 = vld [vmem:[%s6026_s3 + $0xb0] sm:$0xff]  ;;  %v1729_v30 = vld [vmem:[%s6026_s3 + $0xe0] sm:$0xff] }
 0x28b   : > { %4740 = vmatprep.subr.mxu0 %v5108_v40  ;;  %4731 = vmatmul.mubr.msk.f32.vlgmr.msra.gmra.mxu0 %vm881_vm1, %v1673_v44  ;;  %v1703_v44 = vld [vmem:[%s6026_s3 + $0x10] sm:$0xff]  ;;  %v979_v27 = vsel %vm881_vm1, %v967_v41, 0.0  ;;  %v1494_v57 = vcombine.high %v1470_v42, %v5108_v40  ;;  %v975_v17 = vadd.f32 %v974_v28, %v973_v49  ;;  %v1732_v28 = vld [vmem:[%s6026_s3 + $0xf8] sm:$0xff] }
 0x28c   : > { %4735 = vmatprep.subr.mxu1 %v5108_v40  ;;  %4741 = vmatpush3.msra.mxu0 %v1754_v47  ;;  %v981_v47 = vadd.f32 %v980_v34, %v979_v27  ;;  %v1478_v55 = vcombine.low %v1446_v51, %v1461_v22  ;;  %v1479_v7 = vcombine.high %v1446_v51, %v1461_v22  ;;  %v1730_v34 = vld [vmem:[%s6026_s3 + $0xe8] sm:$0xff] }
 0x28d   : > { %4736 = vmatpush3.msra.mxu1 %v1751_v48  ;;  %4737 = vmatprep.mubr.msk.f32.mxu1 %vm5109_vm2, %v5108_v40  ;;  %v1705_v48 = vld [vmem:[%s6026_s3 + $0x20] sm:$0xff] }
 0x28e   : > { %4742 = vmatprep.subr.mxu0 %v5108_v40  ;;  %4738 = vmatmul.mubr.msk.f32.vlgmr.msra.gmra.mxu1 %vm881_vm1, %v1697_v52  ;;  %v1710_v52 = vld [vmem:[%s6026_s3 + $0x48] sm:$0xff]  ;;  %v1493_v59 = vrot.slane %v1479_v7, %v5504_v33 }
 0x28f   : > { %4743 = vmatpush3.msra.mxu0 %v1753_v10  ;;  %4747 = vmatprep.subr.mxu1 %v5108_v40  ;;  %v986_v10 = vmul.f32 0.5, %v981_v47  ;;  %v1731_v47 = vld [vmem:[%s6026_s3 + $0xf0] sm:$0xff] }
 0x290   : > { %4744 = vmatprep.mubr.msk.f32.mxu0 %vm5109_vm2, %v5108_v40  ;;  %4748 = vmatpush3.msra.mxu1 %v1756_v58  ;;  %v984_v58 = vmul.f32 0.5, %v975_v17 }
 0x291   : > { %4754 = vmatprep.subr.mxu0 %v5108_v40  ;;  %4745 = vmatmul.mubr.msk.f32.vlgmr.msra.gmra.mxu0 %vm881_vm1, %v1680_v1  ;;  %v1709_v1 = vld [vmem:[%s6026_s3 + $0x40] sm:$0xff]  ;;  %v1431_v4 = vmul.f32 %v5673_v46, %v986_v10 }
 0x292   : > { %4749 = vmatprep.subr.mxu1 %v5108_v40  ;;  %4755 = vmatpush3.msra.mxu0 %v1758_v3  ;;  %v1486_v3 = vrot.slane %v1478_v55, %v5504_v33 }
 0x293   : > { %4750 = vmatpush3.msra.mxu1 %v1755_v62  ;;  %4751 = vmatprep.mubr.msk.f32.mxu1 %vm5109_vm2, %v5108_v40  ;;  %v1714_v62 = vld [vmem:[%s6026_s3 + $0x68] sm:$0xff]  ;;  %v1513_v20 = vcombine.high %v1431_v4, %v5108_v40 }
 0x294   : > { %4756 = vmatprep.subr.mxu0 %v5108_v40  ;;  %4752 = vmatmul.mubr.msk.f32.vlgmr.msra.gmra.mxu1 %vm881_vm1, %v1698_v8  ;;  %v1429_v8 = vmul.f32 %v5673_v46, %v984_v58  ;;  %v1716_v46 = vld [vmem:[%s6026_s3 + $0x78] sm:$0xff] }
 0x295   : > { %4757 = vmatpush3.msra.mxu0 %v1757_v9  ;;  %4761 = vmatprep.subr.mxu1 %v5108_v40  ;;  %v1496_v9 = vcombine.high %v1486_v3, %v5108_v40  ;;  %v1527_v61 = vrot.slane %v1513_v20, %v5499_v5 }
 0x296   : > { %4758 = vmatprep.mubr.msk.f32.mxu0 %vm5109_vm2, %v5108_v40  ;;  %4762 = vmatpush3.msra.mxu1 %v1760_v54  ;;  %v1713_v54 = vld [vmem:[%s6026_s3 + $0x60] sm:$0xff] }
 0x297   : > { %4768 = vmatprep.subr.mxu0 %v5108_v40  ;;  %4759 = vmatmul.mubr.msk.f32.vlgmr.msra.gmra.mxu0 %vm881_vm1, %v1689_v11  ;;  %v1520_v11 = vrot.slane %v1431_v4, %v5499_v5 }
 0x298   : > { %4763 = vmatprep.subr.mxu1 %v5108_v40  ;;  %4769 = vmatpush3.msra.mxu0 %v1762_v56  ;;  %v1505_v56 = vrot.slane %v1429_v8, %v5499_v5 }
 0x299   : > { %4764 = vmatpush3.msra.mxu1 %v1759_v13  ;;  %4765 = vmatprep.mubr.msk.f32.mxu1 %vm5109_vm2, %v5108_v40  ;;  %v1718_v13 = vld [vmem:[%s6026_s3 + $0x88] sm:$0xff] }
 0x29a   : > { %4770 = vmatprep.subr.mxu0 %v5108_v40  ;;  %4766 = vmatmul.mubr.msk.f32.vlgmr.msra.gmra.mxu1 %vm881_vm1, %v1699_v16  ;;  %v1528_v15 = vcombine.low %v1505_v56, %v1520_v11  ;;  %v1497_v16 = vcombine.high %v1493_v59, %v5108_v40  ;;  %v1529_v12 = vcombine.high %v1505_v56, %v1520_v11 }
 0x29b   : > { %4771 = vmatpush3.msra.mxu0 %v1761_v18  ;;  %4775 = vmatprep.subr.mxu1 %v5108_v40  ;;  %v1717_v18 = vld [vmem:[%s6026_s3 + $0x80] sm:$0xff] }
 0x29c   : > { %4772 = vmatprep.mubr.msk.f32.mxu0 %vm5109_vm2, %v5108_v40  ;;  %4776 = vmatpush3.msra.mxu1 %v1764_v63  ;;  %v1536_v63 = vrot.slane %v1528_v15, %v5504_v33  ;;  %v1543_v32 = vrot.slane %v1529_v12, %v5504_v33 }
 0x29d   : > { %4782 = vmatprep.subr.mxu0 %v5108_v40  ;;  %4773 = vmatmul.mubr.msk.f32.vlgmr.msra.gmra.mxu0 %vm881_vm1, %v1696_v21  ;;  %v1722_v21 = vld [vmem:[%s6026_s3 + $0xa8] sm:$0xff] }
 0x29e   : > { %4777 = vmatprep.subr.mxu1 %v5108_v40  ;;  %4783 = vmatpush3.msra.mxu0 %v1702_v24  ;;  %v1498_v24 = vcombine.high %v1429_v8, %v5108_v40  ;;  %v1560_v25 = vcombine.high %v1536_v63, %v5108_v40 }
 0x29f   : > { %4778 = vmatpush3.msra.mxu1 %v1763_v26  ;;  %4779 = vmatprep.mubr.msk.f32.mxu1 %vm5109_vm2, %v5108_v40  ;;  %v1721_v26 = vld [vmem:[%s6026_s3 + $0xa0] sm:$0xff] }
 0x2a0   : > { %4784 = vmatprep.subr.mxu0 %v5108_v40  ;;  %4780 = vmatmul.mubr.msk.f32.vlgmr.msra.gmra.mxu1 %vm881_vm1, %v1700_v36  ;;  %v1512_v36 = vrot.slane %v1498_v24, %v5499_v5 }
 0x2a1   : > { %4785 = vmatpush3.msra.mxu0 %v1701_v37  ;;  %4789 = vmatprep.subr.mxu1 %v5108_v40  ;;  %v1726_v37 = vld [vmem:[%s6026_s3 + $0xc8] sm:$0xff] }
 0x2a2   : > { %4786 = vmatprep.mubr.msk.f32.mxu0 %vm5109_vm2, %v5108_v40  ;;  %4790 = vmatpush3.msra.mxu1 %v1704_v38  ;;  %v1544_v41 = vcombine.low %v1512_v36, %v1527_v61  ;;  %v1561_v38 = vcombine.high %v1543_v32, %v5108_v40 }
 0x2a3   : > { %4796 = vmatprep.subr.mxu0 %v5108_v40  ;;  %4787 = vmatmul.mubr.msk.f32.vlgmr.msra.gmra.mxu0 %vm881_vm1, %v1470_v42  ;;  %v1725_v42 = vld [vmem:[%s6026_s3 + $0xc0] sm:$0xff] }
 0x2a4   : > { %4791 = vmatprep.subr.mxu1 %v5108_v40  ;;  %4797 = vmatpush3.msra.mxu0 %v1706_v31  ;;  %v1552_v35 = vrot.slane %v1544_v41, %v5504_v33  ;;  %v1545_v31 = vcombine.high %v1512_v36, %v1527_v61 }
 0x2a5   : > { %4792 = vmatpush3.msra.mxu1 %v1703_v44  ;;  %4793 = vmatprep.mubr.msk.f32.mxu1 %vm5109_vm2, %v5108_v40  ;;  %v1727_v44 = vld [vmem:[%s6026_s3 + $0xd0] sm:$0xff] }
 0x2a6   : > { %4798 = vmatprep.subr.mxu0 %v5108_v40  ;;  %4794 = vmatmul.mubr.msk.f32.vlgmr.msra.gmra.mxu1 %vm881_vm1, %v1494_v57  ;;  %v1562_v45 = vcombine.high %v1552_v35, %v5108_v40  ;;  %v1559_v27 = vrot.slane %v1545_v31, %v5504_v33 }
 0x2a7   : > { %4799 = vmatpush3.msra.mxu0 %v1705_v48  ;;  %4803 = vmatprep.subr.mxu1 %v5108_v40 }
 0x2a8   : > { %4800 = vmatprep.mubr.msk.f32.mxu0 %vm5109_vm2, %v5108_v40  ;;  %4804 = vmatpush3.msra.mxu1 %v1708_v60  ;;  %v1563_v57 = vcombine.high %v1559_v27, %v5108_v40 }
 0x2a9   : > { %4810 = vmatprep.subr.mxu0 %v5108_v40  ;;  %4801 = vmatmul.mubr.msk.f32.vlgmr.msra.gmra.mxu0 %vm881_vm1, %v1477_v50 }
 0x2aa   : > { %4805 = vmatprep.subr.mxu1 %v5108_v40  ;;  %4811 = vmatpush3.msra.mxu0 %v1710_v52 }
 0x2ab   : > { %4806 = vmatpush3.msra.mxu1 %v1707_v53  ;;  %4807 = vmatprep.mubr.msk.f32.mxu1 %vm5109_vm2, %v5108_v40 }
 0x2ac   : > { %4812 = vmatprep.subr.mxu0 %v5108_v40  ;;  %4808 = vmatmul.mubr.msk.f32.vlgmr.msra.gmra.mxu1 %vm881_vm1, %v1495_v0 }
 0x2ad   : > { %4813 = vmatpush3.msra.mxu0 %v1709_v1  ;;  %4817 = vmatprep.subr.mxu1 %v5108_v40 }
 0x2ae   : > { %4814 = vmatprep.mubr.msk.f32.mxu0 %vm5109_vm2, %v5108_v40  ;;  %4818 = vmatpush3.msra.mxu1 %v1712_v2 }
 0x2af   : > { %4824 = vmatprep.subr.mxu0 %v5108_v40  ;;  %4815 = vmatmul.mubr.msk.f32.vlgmr.msra.gmra.mxu0 %vm881_vm1, %v1486_v3 }
 0x2b0   : > { %4819 = vmatprep.subr.mxu1 %v5108_v40  ;;  %4825 = vmatpush3.msra.mxu0 %v1714_v62 }
 0x2b1   : > { %4820 = vmatpush3.msra.mxu1 %v1711_v6  ;;  %4821 = vmatprep.mubr.msk.f32.mxu1 %vm5109_vm2, %v5108_v40 }
 0x2b2   : > { %4826 = vmatprep.subr.mxu0 %v5108_v40  ;;  %4822 = vmatmul.mubr.msk.f32.vlgmr.msra.gmra.mxu1 %vm881_vm1, %v1496_v9 }
 0x2b3   : > { %4827 = vmatpush3.msra.mxu0 %v1713_v54  ;;  %4831 = vmatprep.subr.mxu1 %v5108_v40 }
 0x2b4   : > { %4828 = vmatprep.mubr.msk.f32.mxu0 %vm5109_vm2, %v5108_v40  ;;  %4832 = vmatpush3.msra.mxu1 %v1716_v46 }
 0x2b5   : > { %4838 = vmatprep.subr.mxu0 %v5108_v40  ;;  %4829 = vmatmul.mubr.msk.f32.vlgmr.msra.gmra.mxu0 %vm881_vm1, %v1493_v59 }
 0x2b6   : > { %4833 = vmatprep.subr.mxu1 %v5108_v40  ;;  %4839 = vmatpush3.msra.mxu0 %v1718_v13 }
 0x2b7   : > { %4834 = vmatpush3.msra.mxu1 %v1715_v14  ;;  %4835 = vmatprep.mubr.msk.f32.mxu1 %vm5109_vm2, %v5108_v40 }
 0x2b8   : > { %4840 = vmatprep.subr.mxu0 %v5108_v40  ;;  %4836 = vmatmul.mubr.msk.f32.vlgmr.msra.gmra.mxu1 %vm881_vm1, %v1497_v16 }
 0x2b9   : > { %4841 = vmatpush3.msra.mxu0 %v1717_v18  ;;  %4845 = vmatprep.subr.mxu1 %v5108_v40 }
 0x2ba   : > { %4842 = vmatprep.mubr.msk.f32.mxu0 %vm5109_vm2, %v5108_v40  ;;  %4846 = vmatpush3.msra.mxu1 %v1720_v19 }
 0x2bb   : > { %4852 = vmatprep.subr.mxu0 %v5108_v40  ;;  %4843 = vmatmul.mubr.msk.f32.vlgmr.msra.gmra.mxu0 %vm881_vm1, %v1536_v63 }
 0x2bc   : > { %4847 = vmatprep.subr.mxu1 %v5108_v40  ;;  %4853 = vmatpush3.msra.mxu0 %v1722_v21 }
 0x2bd   : > { %4848 = vmatpush3.msra.mxu1 %v1719_v23  ;;  %4849 = vmatprep.mubr.msk.f32.mxu1 %vm5109_vm2, %v5108_v40 }
 0x2be   : > { %4854 = vmatprep.subr.mxu0 %v5108_v40  ;;  %4850 = vmatmul.mubr.msk.f32.vlgmr.msra.gmra.mxu1 %vm881_vm1, %v1560_v25 }
 0x2bf   : > { %4855 = vmatpush3.msra.mxu0 %v1721_v26  ;;  %4859 = vmatprep.subr.mxu1 %v5108_v40 }
 0x2c0   : > { %4856 = vmatprep.mubr.msk.f32.mxu0 %vm5109_vm2, %v5108_v40  ;;  %4860 = vmatpush3.msra.mxu1 %v1724_v29 }
 0x2c1   : > { %4866 = vmatprep.subr.mxu0 %v5108_v40  ;;  %4857 = vmatmul.mubr.msk.f32.vlgmr.msra.gmra.mxu0 %vm881_vm1, %v1543_v32 }
 0x2c2   : > { %4861 = vmatprep.subr.mxu1 %v5108_v40  ;;  %4867 = vmatpush3.msra.mxu0 %v1726_v37 }
 0x2c3   : > { %4862 = vmatpush3.msra.mxu1 %v1723_v39  ;;  %4863 = vmatprep.mubr.msk.f32.mxu1 %vm5109_vm2, %v5108_v40 }
 0x2c4   : > { %4868 = vmatprep.subr.mxu0 %v5108_v40  ;;  %4864 = vmatmul.mubr.msk.f32.vlgmr.msra.gmra.mxu1 %vm881_vm1, %v1561_v38 }
 0x2c5   : > { %4869 = vmatpush3.msra.mxu0 %v1725_v42  ;;  %4873 = vmatprep.subr.mxu1 %v5108_v40 }
 0x2c6   : > { %4870 = vmatprep.mubr.msk.f32.mxu0 %vm5109_vm2, %v5108_v40  ;;  %4874 = vmatpush3.msra.mxu1 %v1728_v43 }
 0x2c7   : > { %4880 = vmatprep.subr.mxu0 %v5108_v40  ;;  %4871 = vmatmul.mubr.msk.f32.vlgmr.msra.gmra.mxu0 %vm881_vm1, %v1552_v35 }
 0x2c8   : > { %4875 = vmatprep.subr.mxu1 %v5108_v40  ;;  %4881 = vmatpush3.msra.mxu0 %v1730_v34 }
 0x2c9   : > { %4876 = vmatpush3.msra.mxu1 %v1727_v44  ;;  %4877 = vmatprep.mubr.msk.f32.mxu1 %vm5109_vm2, %v5108_v40 }
 0x2ca   : > { %4882 = vmatprep.subr.mxu0 %v5108_v40  ;;  %4878 = vmatmul.mubr.msk.f32.vlgmr.msra.gmra.mxu1 %vm881_vm1, %v1562_v45 }
 0x2cb   : > { %4883 = vmatpush3.msra.mxu0 %v1729_v30  ;;  %4887 = vmatprep.subr.mxu1 %v5108_v40 }
 0x2cc   : > { %4884 = vmatprep.mubr.msk.f32.mxu0 %vm5109_vm2, %v5108_v40  ;;  %4888 = vmatpush3.msra.mxu1 %v1732_v28 }
 0x2cd   : > { %4885 = vmatmul.mubr.msk.f32.vlgmr.msra.gmra.mxu0 %vm881_vm1, %v1559_v27  ;;  %4889 = vmatprep.subr.mxu1 %v5108_v40 }
 0x2ce   : > { %4890 = vmatpush3.msra.mxu1 %v1731_v47  ;;  %4891 = vmatprep.mubr.msk.f32.mxu1 %vm5109_vm2, %v5108_v40 }
 0x2cf   : > { %4892 = vmatmul.mubr.msk.f32.vlgmr.msra.gmra.mxu1 %vm881_vm1, %v1563_v57 }
 0x335   : > { %v1834_v48 = vpop.f32.mrf.mxu0 }
 0x337   : > { %v4676_v22 = vpop.f32.mrf.mxu0  ;;  %v1907_v49 = vpop.f32.mrf.mxu1 }
 0x339   : > { %v4683_v60 = vpop.f32.mrf.mxu1  ;;  %v1980_v17 = vpop.f32.mrf.mxu0 }
 0x33b   : > { %v4690_v50 = vpop.f32.mrf.mxu0 }
 0x33c   : > { %v2053_v51 = vpop.f32.mrf.mxu1 }
 0x33e   : > { %v4697_v52 = vpop.f32.mrf.mxu1 }
 0x33f   : > { %v2126_v10 = vpop.f32.mrf.mxu0 }
 0x341   : > { %v4704_v53 = vpop.f32.mrf.mxu0 }
 0x342   : > { %v2199_v55 = vpop.f32.mrf.mxu1 }
 0x344   : > { %v4711_v58 = vpop.f32.mrf.mxu1 }
 0x345   : > { %v2272_v0 = vpop.f32.mrf.mxu0 }
 0x347   : > { %v4718_v1 = vpop.f32.mrf.mxu0 }
 0x348   : > { %v2345_v2 = vpop.f32.mrf.mxu1 }
 0x34a   : > { %v4725_v3 = vpop.f32.mrf.mxu1 }
 0x34b   : > { %v5934_v4 = vpop.f32.mrf.mxu0 }
 0x34d   : > { %v4732_v62 = vpop.f32.mrf.mxu0 }
 0x34e   : > { %v2491_v6 = vpop.f32.mrf.mxu1 }
 0x350   : > { %v4739_v7 = vpop.f32.mrf.mxu1 }
 0x351   : > { %v5936_v8 = vpop.f32.mrf.mxu0 }
 0x353   : > { %v4746_v9 = vpop.f32.mrf.mxu0 }
 0x354   : > { %v5938_v54 = vpop.f32.mrf.mxu1 }
 0x356   : > { %v4753_v11 = vpop.f32.mrf.mxu1 }
 0x357   : > { %v5940_v46 = vpop.f32.mrf.mxu0 }
 0x359   : > { %v4760_v59 = vpop.f32.mrf.mxu0 }
 0x35a   : > { %v5942_v56 = vpop.f32.mrf.mxu1 }
 0x35c   : > { %v4767_v13 = vpop.f32.mrf.mxu1 }
 0x35d   : > { %v5944_v14 = vpop.f32.mrf.mxu0 }
 0x35f   : > { %v4774_v15 = vpop.f32.mrf.mxu0 }
 0x360   : > { %v5946_v16 = vpop.f32.mrf.mxu1 }
 0x362   : > { %v4781_v18 = vpop.f32.mrf.mxu1 }
 0x363   : > { %v3002_v19 = vpop.f32.mrf.mxu0 }
 0x364   : > { %v3003_v29 = vadd.f32 %v3002_v19, %v1834_v48 }
 0x365   : > { %v4788_v63 = vpop.f32.mrf.mxu0 }
 0x366   : > { %v3075_v20 = vpop.f32.mrf.mxu1 }
 0x367   : > { %v3076_v32 = vadd.f32 %v3075_v20, %v1907_v49 }
 0x368   : > { %v4795_v21 = vpop.f32.mrf.mxu1 }
 0x369   : > { %v3148_v23 = vpop.f32.mrf.mxu0  ;;  %v4101_v38 = vcombine.low %v5108_v40, %v3076_v32 }
 0x36a   : > { %v3149_v25 = vadd.f32 %v3148_v23, %v1980_v17 }
 0x36b   : > { %v4802_v12 = vpop.f32.mrf.mxu0  ;;  %v4108_v28 = vrot.slane %v4101_v38, %v5499_v5 }
 0x36c   : > { %v3221_v24 = vpop.f32.mrf.mxu1  ;;  %v4109_v37 = vcombine.low %v3003_v29, %v3149_v25 }
 0x36d   : > { %v3222_v42 = vadd.f32 %v3221_v24, %v2053_v51 }
 0x36e   : > { %v4809_v26 = vpop.f32.mrf.mxu1  ;;  %v4116_v34 = vrot.slane %v4109_v37, %v5499_v5 }
 0x36f   : > { %v3294_v61 = vpop.f32.mrf.mxu0 }
 0x370   : > { %v3295_v31 = vadd.f32 %v3294_v61, %v2126_v10  ;;  %v4133_v57 = vcombine.low %v4108_v28, %v4116_v34 }
 0x371   : > { %v4816_v36 = vpop.f32.mrf.mxu0 }
 0x372   : > { %v3367_v39 = vpop.f32.mrf.mxu1  ;;  %v4140_v51 = vrot.slane %v4133_v57, %v5504_v33 }
 0x373   : > { %v3368_v41 = vadd.f32 %v3367_v39, %v2199_v55 }
 0x374   : > { %v4823_v43 = vpop.f32.mrf.mxu1 }
 0x375   : > { %v3440_v35 = vpop.f32.mrf.mxu0  ;;  %v4117_v44 = vcombine.low %v3222_v42, %v3368_v41 }
 0x376   : > { %v3441_v45 = vadd.f32 %v3440_v35, %v2272_v0 }
 0x377   : > { %v4830_v30 = vpop.f32.mrf.mxu0  ;;  %v4124_v48 = vrot.slane %v4117_v44, %v5499_v5 }
 0x378   : > { %v4125_v27 = vcombine.low %v3295_v31, %v3441_v45  ;;  %v3513_v47 = vpop.f32.mrf.mxu1 }
 0x379   : > { %v3514_v0 = vadd.f32 %v3513_v47, %v2345_v2 }
 0x37a   : > { %v4132_v22 = vrot.slane %v4125_v27, %v5499_v5  ;;  %v4837_v49 = vpop.f32.mrf.mxu1 }
 0x37b   : > { %v3586_v60 = vpop.f32.mrf.mxu0 }
 0x37c   : > { %v4141_v17 = vcombine.low %v4124_v48, %v4132_v22  ;;  %v3587_v62 = vadd.f32 %v3586_v60, %v5934_v4 }
 0x37d   : > { %v4844_v50 = vpop.f32.mrf.mxu0 }
 0x37e   : > { %v4148_v52 = vrot.slane %v4141_v17, %v5504_v33  ;;  %v3659_v10 = vpop.f32.mrf.mxu1 }
 0x37f   : > { %v3660_v53 = vadd.f32 %v3659_v10, %v2491_v6 }
 0x380   : > { %v4149_v55 = vcombine.low %v4140_v51, %v4148_v52  ;;  %v4150_v58 = vcombine.high %v4140_v51, %v4148_v52  ;;  %v4851_v1 = vpop.f32.mrf.mxu1 }
 0x381   : > { %v3732_v3 = vpop.f32.mrf.mxu0  ;;  %v4151_v7 = vcombine.low %v3514_v0, %v3660_v53 }
 0x382   : > { %4210 = vst.msk [vmem:[%s5957_s12] sm:$0xff] %vm4209_vm3, %v4149_v55  ;;  %4214 = vst.msk [vmem:[%s5957_s12 + $0x18] sm:$0xff] %vm4209_vm3, %v4150_v58  ;;  %v3733_v9 = vadd.f32 %v3732_v3, %v5936_v8 }
 0x383   : > { %v4858_v11 = vpop.f32.mrf.mxu0  ;;  %v4158_v2 = vrot.slane %v4151_v7, %v5499_v5 }
 0x384   : > { %v4159_v6 = vcombine.low %v3587_v62, %v3733_v9  ;;  %v3805_v59 = vpop.f32.mrf.mxu1 }
 0x385   : > { %v3806_v23 = vadd.f32 %v3805_v59, %v5938_v54 }
 0x386   : > { %v4166_v13 = vrot.slane %v4159_v6, %v5499_v5  ;;  %v4865_v15 = vpop.f32.mrf.mxu1 }
 0x387   : > { %v3878_v18 = vpop.f32.mrf.mxu0 }
 0x388   : > { %v4183_v19 = vcombine.low %v4158_v2, %v4166_v13  ;;  %v3879_v8 = vadd.f32 %v3878_v18, %v5940_v46 }
 0x389   : > { %v4872_v63 = vpop.f32.mrf.mxu0 }
 0x38a   : > { %v3951_v20 = vpop.f32.mrf.mxu1 }
 0x38b   : > { %v3952_v21 = vadd.f32 %v3951_v20, %v5942_v56 }
 0x38c   : > { %v4879_v4 = vpop.f32.mrf.mxu1 }
 0x38d   : > { %v4024_v12 = vpop.f32.mrf.mxu0  ;;  %v4167_v24 = vcombine.low %v3806_v23, %v3952_v21 }
 0x38e   : > { %v4025_v25 = vadd.f32 %v4024_v12, %v5944_v14  ;;  %v4190_v14 = vrot.slane %v4183_v19, %v5504_v33 }
 0x38f   : > { %v4886_v26 = vpop.f32.mrf.mxu0  ;;  %v4097_v61 = vpop.f32.mrf.mxu1  ;;  %v4174_v54 = vrot.slane %v4167_v24, %v5499_v5 }
 0x390   : > { %v4175_v29 = vcombine.low %v3879_v8, %v4025_v25  ;;  %v4098_v32 = vadd.f32 %v4097_v61, %v5946_v16  ;;  %v4274_v16 = vld [vmem:[%s5957_s12 + $0x18] sm:$0xff] (%p5242_p5) }
 0x391   : > { %v4893_v56 = vpop.f32.mrf.mxu1  ;;  %4275 = vst [vmem:[%s4229_s28 + $0x60] sm:$0xff] (%p5242_p5), %v4274_v16 }
 0x392   : > { %v4182_v36 = vrot.slane %v4175_v29, %v5499_v5  ;;  %v4207_v37 = vrot.slane %v4098_v32, %v5504_v33 }
 0x394   : > { %v4191_v46 = vcombine.low %v4174_v54, %v4182_v36  ;;  %v4208_v39 = vcombine.high %v4207_v37, %v5108_v40  ;;  %4213 = vst.msk [vmem:[%s5957_s12 + $0x10] sm:$0x1] %vm4212_vm4, %v4207_v37  ;;  %v4268_v40 = vld [vmem:[%s5957_s12] sm:$0xff] (%p5242_p5) }
 0x395   : > { %4269 = vst [vmem:[%s4229_s28] sm:$0xff] (%p5242_p5), %v4268_v40 }
 0x396   : > { %v4198_v41 = vrot.slane %v4191_v46, %v5504_v33  ;;  %4216 = vst.msk [vmem:[%s5957_s12 + $0x28] sm:$0x1] %vm4212_vm4, %v4208_v39  ;;  %4223 = sbr.rel (!%p5242_p5) target bundleno = 931 (0x3a3), region = 158 }
 0x398   : > { %v4199_v38 = vcombine.low %v4190_v14, %v4198_v41  ;;  %v4200_v42 = vcombine.high %v4190_v14, %v4198_v41 }
 0x39a   : > { %4211 = vst.msk [vmem:[%s5957_s12 + $0x8] sm:$0xff] %vm4209_vm3, %v4199_v38  ;;  %4215 = vst.msk [vmem:[%s5957_s12 + $0x20] sm:$0xff] %vm4209_vm3, %v4200_v42 }
 0x39b   : > { %v4272_v33 = vld [vmem:[%s5957_s12 + $0x10] sm:$0xff] }
 0x39c   : > { %4273 = vst [vmem:[%s4229_s28 + $0x10] sm:$0xff] %v4272_v33 }
 0x39d   : > { %v4278_v35 = vld [vmem:[%s5957_s12 + $0x28] sm:$0xff] }
 0x39e   : > { %4279 = vst [vmem:[%s4229_s28 + $0x70] sm:$0xff] %v4278_v35 }
 0x3a1   : > { %v4270_v5 = vld [vmem:[%s5957_s12 + $0x8] sm:$0xff]  ;;  %v4276_v43 = vld [vmem:[%s5957_s12 + $0x20] sm:$0xff] }
 0x3a2   : > { %4271 = vst [vmem:[%s4229_s28 + $0x8] sm:$0xff] %v4270_v5  ;;  %4277 = vst [vmem:[%s4229_s28 + $0x68] sm:$0xff] %v4276_v43 }
 0x3a3 PF: > { %s15_s26 = sadd.s32 1, %s5106_s26   ;;  %s6037_s7 = sld [smem:[#allocation6_spill]] }
 0x3a4   : > { %p12_p9 = scmp.ge.s32.totalorder %s15_s26, 6   ;;  %s6038_s18 = smov %s5078_s19 }
 0x3a5   : > { %s6039_s19 = smov %s5247_s8  ;;  %s6040_s20 = smov %s5086_s21 }
 0x3a6   : > { %s6041_s21 = smov %s5227_s15  ;;  %s6042_s22 = smov %s5094_s23 }
 0x3a7   : > { %s6043_s23 = smov %s5210_s9  ;;  %s6044_s24 = smov %s5102_s25 }
 0x3a8   :  { %14 = sbr.rel (!%p12_p9) target bundleno = 7 (0x7), region = 243 }
 0x3a9   : > { %s6045_s25 = smov %s6037_s7 }

</bundles_post_ra>
